<compile_context>
chip_gen: v5e
topology: v5e:2x2
jax: 0.10.0
libtpu: 0.0.40
codegen_flags: <defaults>
</compile_context>

<pallas_src>
import jax
import jax.numpy as jnp
from jax import lax
from jax.experimental import pallas as pl
from jax.experimental.pallas import tpu as pltpu


def dwconv_kernel(x_ref, w_ref, b_ref, o_ref, xp_ref):
    """Depthwise 3x3, stride 1, pad 1, channels-last.

    x_ref : (nb, H, W, C)      input images (C on lanes, W on sublanes)
    w_ref : (9, C)             depthwise taps, row k = ky*3 + kx, lane-dense in C
    b_ref : (1, C)             bias
    o_ref : (nb, H, W, C)      output
    xp_ref: (nb, H+2, W+2, C)  VMEM scratch: input with 1-pixel zero halo
    """
    nb, H, W, C = o_ref.shape

    # Zero only the 1-pixel halo ring (not the whole padded buffer), then copy
    # the interior.  The halo never round-trips through HBM.
    zrow = jnp.zeros((nb, 1, W + 2, C), jnp.float32)
    xp_ref[:, 0:1, :, :] = zrow
    xp_ref[:, H + 1:H + 2, :, :] = zrow
    zcol = jnp.zeros((nb, H, 1, C), jnp.float32)
    xp_ref[:, 1:H + 1, 0:1, :] = zcol
    xp_ref[:, 1:H + 1, W + 1:W + 2, :] = zcol
    xp_ref[:, 1:H + 1, 1:W + 1, :] = x_ref[...].astype(jnp.float32)

    w = w_ref[...]                                     # (9, C), loaded once
    acc = jnp.zeros((nb, H, W, C), jnp.float32)
    for kx in range(3):
        # One sublane-shifted column view per kx; the ky shifts below are cheap
        # major-dim slices of this value (no further relayout).
        xc = xp_ref[:, :, kx:kx + W, :]                # (nb, H+2, W, C)
        for ky in range(3):
            wv = w[ky * 3 + kx, :].reshape(1, 1, 1, C)  # per-channel tap weight
            acc = acc + xc[:, ky:ky + H] * wv
    acc = acc + b_ref[...].reshape(1, 1, 1, C)
    o_ref[...] = acc.astype(o_ref.dtype)


def _pick_images_per_block(BP, H, W, C, vmem_budget_bytes=16 << 20, max_nb=8):
    """Largest divisor of BP (capped) whose pipeline footprint fits the budget."""
    # f32 bytes per image: double-buffered input + output blocks + halo scratch.
    per_img = 4 * C * (2 * H * W + 2 * H * W + (H + 2) * (W + 2))
    cap = max(1, min(max_nb, vmem_budget_bytes // max(per_img, 1)))
    nb = 1
    for d in range(1, BP + 1):
        if BP % d == 0 and d <= cap:
            nb = d
    return nb


def dwconv_forward(x, weight, bias, H, W):
    """Matches DWConv.forward.

    x:      (b, p, N, C) with N == H*W   (already channels-last -> no transposes)
    weight: (C, 1, 3, 3)  PyTorch depthwise Conv2d weight
    bias:   (C,)
    returns (b, p, N, C)
    """
    b, p, N, C = x.shape
    assert N == H * W, (N, H, W)
    BP = b * p
    xr = x.reshape(BP, H, W, C)
    w9c = jnp.transpose(weight.reshape(C, 9), (1, 0)).astype(jnp.float32)  # (9, C)
    b1c = bias.reshape(1, C).astype(jnp.float32)

    nb = _pick_images_per_block(BP, H, W, C)

    # TODO(synk): for very large H*W a single image exceeds the VMEM budget;
    # add a row-tiled grid dimension with an overlapping (haloed) input block.
    out = pl.pallas_call(
        dwconv_kernel,
        out_shape=jax.ShapeDtypeStruct((BP, H, W, C), x.dtype),
        grid=(BP // nb,),
        in_specs=[
            pl.BlockSpec((nb, H, W, C), lambda n: (n, 0, 0, 0)),
            pl.BlockSpec((9, C), lambda n: (0, 0)),
            pl.BlockSpec((1, C), lambda n: (0, 0)),
        ],
        out_specs=pl.BlockSpec((nb, H, W, C), lambda n: (n, 0, 0, 0)),
        scratch_shapes=[pltpu.VMEM((nb, H + 2, W + 2, C), jnp.float32)],
        compiler_params=pltpu.CompilerParams(dimension_semantics=("parallel",)),
    )(xr, w9c, b1c)
    return out.reshape(b, p, N, C)


def reference_forward(x, weight, bias, H, W):
    b, p, N, C = x.shape
    xr = x.reshape(b * p, H, W, C).astype(jnp.float32)
    w_hwio = jnp.transpose(weight, (2, 3, 1, 0)).astype(jnp.float32)  # (3,3,1,C)
    y = lax.conv_general_dilated(
        xr, w_hwio, window_strides=(1, 1), padding="SAME",
        dimension_numbers=("NHWC", "HWIO", "NHWC"),
        feature_group_count=C, precision=lax.Precision.HIGHEST)
    y = y + bias.reshape(1, 1, 1, C)
    return y.reshape(b, p, N, C)


if __name__ == "__main__":
    key = jax.random.PRNGKey(0)
    kx, kw, kb = jax.random.split(key, 3)

    # DWConv(dim=128) on x: (b=2, p=2, N=H*W=64, C=128) with H=W=8.
    b_, p_, H, W, C = 2, 2, 8, 8, 128
    x = jax.random.normal(kx, (b_, p_, H * W, C), jnp.float32)
    weight = jax.random.normal(kw, (C, 1, 3, 3), jnp.float32) / 3.0
    bias = 0.1 * jax.random.normal(kb, (C,), jnp.float32)

    out = jax.block_until_ready(dwconv_forward(x, weight, bias, H, W))
    ref = reference_forward(x, weight, bias, H, W)

    assert out.shape == (b_, p_, H * W, C), out.shape
    err = float(jnp.max(jnp.abs(out - ref)))
    if err < 1e-3:
        print("KERNEL_OK")
    else:
        print(f"MISMATCH max_abs_err={err}")
</pallas_src>

<mosaic_0001>
module attributes {stable_mosaic.version = 11 : i64} {
  func.func @dwconv_kernel(%arg0: i32, %arg1: memref<4x8x8x128xf32, #tpu.memory_space<vmem>>, %arg2: memref<9x128xf32, #tpu.memory_space<vmem>>, %arg3: memref<1x128xf32, #tpu.memory_space<vmem>>, %arg4: memref<4x8x8x128xf32, #tpu.memory_space<vmem>>, %arg5: memref<4x10x10x128xf32, #tpu.memory_space<vmem>>) attributes {dimension_semantics = [#tpu.dimension_semantics<parallel>], iteration_bounds = array<i64: 1>, scalar_prefetch = 0 : i64, scratch_operands = 1 : i64, tpu.core_type = #tpu.core_type<tc>, window_params = [{transform_indices = @transform_0, window_bounds = array<i64: 4, 8, 8, 128>}, {pipeline_mode = #tpu.pipeline_mode<synchronous>, transform_indices = @transform_1, window_bounds = array<i64: 9, 128>}, {pipeline_mode = #tpu.pipeline_mode<synchronous>, transform_indices = @transform_2, window_bounds = array<i64: 1, 128>}, {transform_indices = @transform_3, window_bounds = array<i64: 4, 8, 8, 128>}]} {
    %cst = arith.constant 0.000000e+00 : f32
    %0 = vector.broadcast %cst : f32 to vector<4x1x10x128xf32>
    %c0 = arith.constant 0 : index
    %c0_0 = arith.constant 0 : index
    %c0_1 = arith.constant 0 : index
    %c0_2 = arith.constant 0 : index
    %1 = vector.load %arg5[%c0, %c0_0, %c0_1, %c0_2] : memref<4x10x10x128xf32, #tpu.memory_space<vmem>>, vector<4x1x10x128xf32>
    tpu.vector_store %arg5[%c0, %c0_0, %c0_1, %c0_2], %0 {strides = array<i32>} : memref<4x10x10x128xf32, #tpu.memory_space<vmem>>, vector<4x1x10x128xf32>,
    %c0_3 = arith.constant 0 : index
    %c9 = arith.constant 9 : index
    %c0_4 = arith.constant 0 : index
    %c0_5 = arith.constant 0 : index
    %2 = vector.load %arg5[%c0_3, %c9, %c0_4, %c0_5] : memref<4x10x10x128xf32, #tpu.memory_space<vmem>>, vector<4x1x10x128xf32>
    tpu.vector_store %arg5[%c0_3, %c9, %c0_4, %c0_5], %0 {strides = array<i32>} : memref<4x10x10x128xf32, #tpu.memory_space<vmem>>, vector<4x1x10x128xf32>,
    %cst_6 = arith.constant 0.000000e+00 : f32
    %3 = vector.broadcast %cst_6 : f32 to vector<4x8x1x128xf32>
    %c0_7 = arith.constant 0 : index
    %c1 = arith.constant 1 : index
    %c0_8 = arith.constant 0 : index
    %c0_9 = arith.constant 0 : index
    %4 = vector.load %arg5[%c0_7, %c1, %c0_8, %c0_9] : memref<4x10x10x128xf32, #tpu.memory_space<vmem>>, vector<4x8x1x128xf32>
    tpu.vector_store %arg5[%c0_7, %c1, %c0_8, %c0_9], %3 {strides = array<i32>} : memref<4x10x10x128xf32, #tpu.memory_space<vmem>>, vector<4x8x1x128xf32>,
    %c0_10 = arith.constant 0 : index
    %c1_11 = arith.constant 1 : index
    %c9_12 = arith.constant 9 : index
    %c0_13 = arith.constant 0 : index
    %5 = vector.load %arg5[%c0_10, %c1_11, %c9_12, %c0_13] : memref<4x10x10x128xf32, #tpu.memory_space<vmem>>, vector<4x8x1x128xf32>
    tpu.vector_store %arg5[%c0_10, %c1_11, %c9_12, %c0_13], %3 {strides = array<i32>} : memref<4x10x10x128xf32, #tpu.memory_space<vmem>>, vector<4x8x1x128xf32>,
    %c0_14 = arith.constant 0 : index
    %c0_15 = arith.constant 0 : index
    %c0_16 = arith.constant 0 : index
    %c0_17 = arith.constant 0 : index
    %6 = vector.load %arg1[%c0_14, %c0_15, %c0_16, %c0_17] : memref<4x8x8x128xf32, #tpu.memory_space<vmem>>, vector<4x8x8x128xf32>
    %c0_18 = arith.constant 0 : index
    %c1_19 = arith.constant 1 : index
    %c1_20 = arith.constant 1 : index
    %c0_21 = arith.constant 0 : index
    %7 = vector.load %arg5[%c0_18, %c1_19, %c1_20, %c0_21] : memref<4x10x10x128xf32, #tpu.memory_space<vmem>>, vector<4x8x8x128xf32>
    tpu.vector_store %arg5[%c0_18, %c1_19, %c1_20, %c0_21], %6 {strides = array<i32>} : memref<4x10x10x128xf32, #tpu.memory_space<vmem>>, vector<4x8x8x128xf32>,
    %c0_22 = arith.constant 0 : index
    %c0_23 = arith.constant 0 : index
    %8 = vector.load %arg2[%c0_22, %c0_23] : memref<9x128xf32, #tpu.memory_space<vmem>>, vector<9x128xf32>
    %cst_24 = arith.constant 0.000000e+00 : f32
    %9 = vector.broadcast %cst_24 : f32 to vector<4x8x8x128xf32>
    %c0_25 = arith.constant 0 : index
    %c0_26 = arith.constant 0 : index
    %c0_27 = arith.constant 0 : index
    %c0_28 = arith.constant 0 : index
    %10 = vector.load %arg5[%c0_25, %c0_26, %c0_27, %c0_28] : memref<4x10x10x128xf32, #tpu.memory_space<vmem>>, vector<4x10x8x128xf32>
    %11 = vector.extract_strided_slice %8 {offsets = [0, 0], sizes = [1, 128], strides = [1, 1]} : vector<9x128xf32> to vector<1x128xf32>
    %12 = vector.shape_cast %11 : vector<1x128xf32> to vector<128xf32>
    %13 = vector.shape_cast %12 : vector<128xf32> to vector<1x1x1x128xf32>
    %14 = vector.extract_strided_slice %10 {offsets = [0, 0, 0, 0], sizes = [4, 8, 8, 128], strides = [1, 1, 1, 1]} : vector<4x10x8x128xf32> to vector<4x8x8x128xf32>
    %15 = vector.broadcast %13 : vector<1x1x1x128xf32> to vector<4x8x8x128xf32>
    %16 = arith.mulf %14, %15 : vector<4x8x8x128xf32>
    %17 = arith.addf %9, %16 : vector<4x8x8x128xf32>
    %18 = vector.extract_strided_slice %8 {offsets = [3, 0], sizes = [1, 128], strides = [1, 1]} : vector<9x128xf32> to vector<1x128xf32>
    %19 = vector.shape_cast %18 : vector<1x128xf32> to vector<128xf32>
    %20 = vector.shape_cast %19 : vector<128xf32> to vector<1x1x1x128xf32>
    %21 = vector.extract_strided_slice %10 {offsets = [0, 1, 0, 0], sizes = [4, 8, 8, 128], strides = [1, 1, 1, 1]} : vector<4x10x8x128xf32> to vector<4x8x8x128xf32>
    %22 = vector.broadcast %20 : vector<1x1x1x128xf32> to vector<4x8x8x128xf32>
    %23 = arith.mulf %21, %22 : vector<4x8x8x128xf32>
    %24 = arith.addf %17, %23 : vector<4x8x8x128xf32>
    %25 = vector.extract_strided_slice %8 {offsets = [6, 0], sizes = [1, 128], strides = [1, 1]} : vector<9x128xf32> to vector<1x128xf32>
    %26 = vector.shape_cast %25 : vector<1x128xf32> to vector<128xf32>
    %27 = vector.shape_cast %26 : vector<128xf32> to vector<1x1x1x128xf32>
    %28 = vector.extract_strided_slice %10 {offsets = [0, 2, 0, 0], sizes = [4, 8, 8, 128], strides = [1, 1, 1, 1]} : vector<4x10x8x128xf32> to vector<4x8x8x128xf32>
    %29 = vector.broadcast %27 : vector<1x1x1x128xf32> to vector<4x8x8x128xf32>
    %30 = arith.mulf %28, %29 : vector<4x8x8x128xf32>
    %31 = arith.addf %24, %30 : vector<4x8x8x128xf32>
    %c0_29 = arith.constant 0 : index
    %c0_30 = arith.constant 0 : index
    %c1_31 = arith.constant 1 : index
    %c0_32 = arith.constant 0 : index
    %32 = vector.load %arg5[%c0_29, %c0_30, %c1_31, %c0_32] : memref<4x10x10x128xf32, #tpu.memory_space<vmem>>, vector<4x10x8x128xf32>
    %33 = vector.extract_strided_slice %8 {offsets = [1, 0], sizes = [1, 128], strides = [1, 1]} : vector<9x128xf32> to vector<1x128xf32>
    %34 = vector.shape_cast %33 : vector<1x128xf32> to vector<128xf32>
    %35 = vector.shape_cast %34 : vector<128xf32> to vector<1x1x1x128xf32>
    %36 = vector.extract_strided_slice %32 {offsets = [0, 0, 0, 0], sizes = [4, 8, 8, 128], strides = [1, 1, 1, 1]} : vector<4x10x8x128xf32> to vector<4x8x8x128xf32>
    %37 = vector.broadcast %35 : vector<1x1x1x128xf32> to vector<4x8x8x128xf32>
    %38 = arith.mulf %36, %37 : vector<4x8x8x128xf32>
    %39 = arith.addf %31, %38 : vector<4x8x8x128xf32>
    %40 = vector.extract_strided_slice %8 {offsets = [4, 0], sizes = [1, 128], strides = [1, 1]} : vector<9x128xf32> to vector<1x128xf32>
    %41 = vector.shape_cast %40 : vector<1x128xf32> to vector<128xf32>
    %42 = vector.shape_cast %41 : vector<128xf32> to vector<1x1x1x128xf32>
    %43 = vector.extract_strided_slice %32 {offsets = [0, 1, 0, 0], sizes = [4, 8, 8, 128], strides = [1, 1, 1, 1]} : vector<4x10x8x128xf32> to vector<4x8x8x128xf32>
    %44 = vector.broadcast %42 : vector<1x1x1x128xf32> to vector<4x8x8x128xf32>
    %45 = arith.mulf %43, %44 : vector<4x8x8x128xf32>
    %46 = arith.addf %39, %45 : vector<4x8x8x128xf32>
    %47 = vector.extract_strided_slice %8 {offsets = [7, 0], sizes = [1, 128], strides = [1, 1]} : vector<9x128xf32> to vector<1x128xf32>
    %48 = vector.shape_cast %47 : vector<1x128xf32> to vector<128xf32>
    %49 = vector.shape_cast %48 : vector<128xf32> to vector<1x1x1x128xf32>
    %50 = vector.extract_strided_slice %32 {offsets = [0, 2, 0, 0], sizes = [4, 8, 8, 128], strides = [1, 1, 1, 1]} : vector<4x10x8x128xf32> to vector<4x8x8x128xf32>
    %51 = vector.broadcast %49 : vector<1x1x1x128xf32> to vector<4x8x8x128xf32>
    %52 = arith.mulf %50, %51 : vector<4x8x8x128xf32>
    %53 = arith.addf %46, %52 : vector<4x8x8x128xf32>
    %c0_33 = arith.constant 0 : index
    %c0_34 = arith.constant 0 : index
    %c2 = arith.constant 2 : index
    %c0_35 = arith.constant 0 : index
    %54 = vector.load %arg5[%c0_33, %c0_34, %c2, %c0_35] : memref<4x10x10x128xf32, #tpu.memory_space<vmem>>, vector<4x10x8x128xf32>
    %55 = vector.extract_strided_slice %8 {offsets = [2, 0], sizes = [1, 128], strides = [1, 1]} : vector<9x128xf32> to vector<1x128xf32>
    %56 = vector.shape_cast %55 : vector<1x128xf32> to vector<128xf32>
    %57 = vector.shape_cast %56 : vector<128xf32> to vector<1x1x1x128xf32>
    %58 = vector.extract_strided_slice %54 {offsets = [0, 0, 0, 0], sizes = [4, 8, 8, 128], strides = [1, 1, 1, 1]} : vector<4x10x8x128xf32> to vector<4x8x8x128xf32>
    %59 = vector.broadcast %57 : vector<1x1x1x128xf32> to vector<4x8x8x128xf32>
    %60 = arith.mulf %58, %59 : vector<4x8x8x128xf32>
    %61 = arith.addf %53, %60 : vector<4x8x8x128xf32>
    %62 = vector.extract_strided_slice %8 {offsets = [5, 0], sizes = [1, 128], strides = [1, 1]} : vector<9x128xf32> to vector<1x128xf32>
    %63 = vector.shape_cast %62 : vector<1x128xf32> to vector<128xf32>
    %64 = vector.shape_cast %63 : vector<128xf32> to vector<1x1x1x128xf32>
    %65 = vector.extract_strided_slice %54 {offsets = [0, 1, 0, 0], sizes = [4, 8, 8, 128], strides = [1, 1, 1, 1]} : vector<4x10x8x128xf32> to vector<4x8x8x128xf32>
    %66 = vector.broadcast %64 : vector<1x1x1x128xf32> to vector<4x8x8x128xf32>
    %67 = arith.mulf %65, %66 : vector<4x8x8x128xf32>
    %68 = arith.addf %61, %67 : vector<4x8x8x128xf32>
    %69 = vector.extract_strided_slice %8 {offsets = [8, 0], sizes = [1, 128], strides = [1, 1]} : vector<9x128xf32> to vector<1x128xf32>
    %70 = vector.shape_cast %69 : vector<1x128xf32> to vector<128xf32>
    %71 = vector.shape_cast %70 : vector<128xf32> to vector<1x1x1x128xf32>
    %72 = vector.extract_strided_slice %54 {offsets = [0, 2, 0, 0], sizes = [4, 8, 8, 128], strides = [1, 1, 1, 1]} : vector<4x10x8x128xf32> to vector<4x8x8x128xf32>
    %73 = vector.broadcast %71 : vector<1x1x1x128xf32> to vector<4x8x8x128xf32>
    %74 = arith.mulf %72, %73 : vector<4x8x8x128xf32>
    %75 = arith.addf %68, %74 : vector<4x8x8x128xf32>
    %c0_36 = arith.constant 0 : index
    %c0_37 = arith.constant 0 : index
    %76 = vector.load %arg3[%c0_36, %c0_37] : memref<1x128xf32, #tpu.memory_space<vmem>>, vector<1x128xf32>
    %77 = vector.shape_cast %76 : vector<1x128xf32> to vector<1x1x1x128xf32>
    %78 = vector.broadcast %77 : vector<1x1x1x128xf32> to vector<4x8x8x128xf32>
    %79 = arith.addf %75, %78 : vector<4x8x8x128xf32>
    %c0_38 = arith.constant 0 : index
    %c0_39 = arith.constant 0 : index
    %c0_40 = arith.constant 0 : index
    %c0_41 = arith.constant 0 : index
    %80 = vector.load %arg4[%c0_38, %c0_39, %c0_40, %c0_41] : memref<4x8x8x128xf32, #tpu.memory_space<vmem>>, vector<4x8x8x128xf32>
    tpu.vector_store %arg4[%c0_38, %c0_39, %c0_40, %c0_41], %79 {strides = array<i32>} : memref<4x8x8x128xf32, #tpu.memory_space<vmem>>, vector<4x8x8x128xf32>,
    return
  }
  func.func @transform_0(%arg0: i32) -> (i32, i32, i32, i32) {
    %c0_i32 = arith.constant 0 : i32
    %c0_i32_0 = arith.constant 0 : i32
    %c0_i32_1 = arith.constant 0 : i32
    %c0_i32_2 = arith.constant 0 : i32
    return %arg0, %c0_i32, %c0_i32_0, %c0_i32_1 : i32, i32, i32, i32
  }
  func.func @transform_1(%arg0: i32) -> (i32, i32) {
    %c0_i32 = arith.constant 0 : i32
    %c0_i32_0 = arith.constant 0 : i32
    %c0_i32_1 = arith.constant 0 : i32
    return %c0_i32, %c0_i32_0 : i32, i32
  }
  func.func @transform_2(%arg0: i32) -> (i32, i32) {
    %c0_i32 = arith.constant 0 : i32
    %c0_i32_0 = arith.constant 0 : i32
    %c0_i32_1 = arith.constant 0 : i32
    return %c0_i32, %c0_i32_0 : i32, i32
  }
  func.func @transform_3(%arg0: i32) -> (i32, i32, i32, i32) {
    %c0_i32 = arith.constant 0 : i32
    %c0_i32_0 = arith.constant 0 : i32
    %c0_i32_1 = arith.constant 0 : i32
    %c0_i32_2 = arith.constant 0 : i32
    return %arg0, %c0_i32, %c0_i32_0, %c0_i32_1 : i32, i32, i32, i32
  }
}

</mosaic_0001>

<bundles_post_ra>
// kernel: tpu_custom_call.1
= control target key start
LH: loop header
LB: loop body
LE: loop exit
PB: predicated region body
PF: predicated region fallthrough
CT: control target
= control target key end

     0   :  { %8 = vsyncpa [#allocation4], 0  ;;  %s1742_s0 = inlined_call_operand.hbm [shape: f32[4,8,8,128], index: 0, kind: input, shape index: {}]   ;;  %s1743_s1 = inlined_call_operand.hbm [shape: f32[9,128], index: 1, kind: input, shape index: {}]   ;;  %s1744_s2 = inlined_call_operand.vmem [shape: f32[1,128], index: 2, kind: input, shape index: {}]   ;;  %s1745_s3 = inlined_call_operand.hbm [shape: f32[4,8,8,128], index: 3, kind: output, shape index: {}]  }
   0x1   :  { %9 = vsyncpa [#allocation7], 0 }
   0x2   :  { %10 = vsyncpa [#allocation5], 0  ;;  %s15_s14 = sshll.u32 %s1742_s0, 4  ;;  %s1077_s15 = smov [#allocation3]   ;;  %s16_s14 = int_to_ptr.hbm [resolvable:$true] %s15_s14 }
   0x3   :  { %s17_s16 = sshll.u32 %s1077_s15, 4  ;;  %s28_s19 = sshll.u32 %s1743_s1, 4  ;;  %s18_s16 = int_to_ptr.vmem [resolvable:$true] %s17_s16  ;;  %s29_s19 = int_to_ptr.hbm [resolvable:$true] %s28_s19 }
   0x4   :  { %s1078_s20 = smov 128   ;;  %s1079_s21 = smov 8  }
   0x5   :  { %23 = dma.hbm_to_vmem [thread:$0]  %s16_s14, 4096, %s18_s16, [#allocation4], %s1078_s20, %s1078_s20, %s1079_s21  }
   0x6   :  { %s1080_s22 = smov [#allocation6]  }
   0x7   :  { %s30_s23 = sshll.u32 %s1080_s22, 4  ;;  %s31_s23 = int_to_ptr.vmem [resolvable:$true] %s30_s23 }
   0x8   :  { %36 = dma.hbm_to_vmem [thread:$0]  %s29_s19, 256, %s31_s23, [#allocation7], %s1078_s20, %s1078_s20, %s1079_s21  }
   0x9   :  { %1071 = dma.done.wait [#allocation4], 4096  }
   0xa   :  { %1072 = vsyncadd [#allocation4], 4294963200 }
   0xb   :  { %1073 = dma.done.wait [#allocation7], 256  }
   0xc   :  { %1074 = vsyncadd [#allocation7], 4294967040  ;;  %v1081_v0 = vmov 0.0   ;;  %v129_v1 = vld [vmem:[#allocation3] sm:$0xff]  ;;  %v130_v2 = vld [vmem:[#allocation3 + $0x8] sm:$0xff]  ;;  %s974_s29 = sshll.u32 %s1745_s3, 4  ;;  %s975_s29 = int_to_ptr.hbm [resolvable:$true] %s974_s29 }
   0xd   :  { %47 = vst [vmem:[#allocation2] sm:$0xff] %v1081_v0  ;;  %v131_v3 = vld [vmem:[#allocation3 + $0x10] sm:$0xff]  ;;  %v193_v4 = vld [vmem:[#allocation6] sm:$0xff]  ;;  %v132_v5 = vld [vmem:[#allocation3 + $0x18] sm:$0xff] }
   0xe   :  { %48 = vst [vmem:[#allocation2 + $0x8] sm:$0x3] %v1081_v0  ;;  %v1195_v6 = vperm.slane %v193_v4, 0  ;;  %v133_v8 = vld [vmem:[#allocation3 + $0x20] sm:$0xff]  ;;  %v134_v9 = vld [vmem:[#allocation3 + $0x28] sm:$0xff]  ;;  %v1197_v10 = vperm.slane %v193_v4, 1 }
   0xf   :  { %49 = vst [vmem:[#allocation2 + $0xa0] sm:$0xff] %v1081_v0  ;;  %v1199_v11 = vperm.slane %v193_v4, 3  ;;  %v1201_v12 = vperm.slane %v193_v4, 6  ;;  %v1203_v13 = vperm.slane %v193_v4, 4  ;;  %v1205_v14 = vperm.slane %v193_v4, 7  ;;  %v1207_v16 = vld [vmem:[#allocation3 + $0x30] sm:$0xff] }
  0x10   :  { %50 = vst [vmem:[#allocation2 + $0xa8] sm:$0x3] %v1081_v0  ;;  %v1210_v17 = vmul.f32 0.0, %v1195_v6  ;;  %v1215_v19 = vperm.slane %v193_v4, 2  ;;  %v1217_v20 = vperm.slane %v193_v4, 5  ;;  %v1219_v21 = vld [vmem:[#allocation3 + $0x38] sm:$0xff]  ;;  %v1228_v24 = vmul.f32 %v1197_v10, %v129_v1 }
  0x11   :  { %51 = vst [vmem:[#allocation2 + $0x140] sm:$0xff] %v1081_v0  ;;  %v1222_v22 = vmul.f32 %v1203_v13, %v129_v1  ;;  %v1225_v23 = vmul.f32 %v1205_v14, %v130_v2  ;;  %v1231_v25 = vmul.f32 %v1197_v10, %v130_v2  ;;  %v1233_v26 = vld [vmem:[#allocation3 + $0x40] sm:$0xff]  ;;  %v1239_v28 = vmul.f32 %v1203_v13, %v130_v2  ;;  %v1248_v31 = vld [vmem:[#allocation3 + $0x48] sm:$0xff]  ;;  %v1263_v36 = vld [vmem:[#allocation3 + $0x50] sm:$0xff] }
  0x12   :  { %52 = vst [vmem:[#allocation2 + $0x148] sm:$0x3] %v1081_v0  ;;  %v1242_v29 = vmul.f32 %v1205_v14, %v131_v3  ;;  %v1245_v30 = vmul.f32 %v1203_v13, %v131_v3  ;;  %v1251_v32 = vmul.f32 %v1205_v14, %v132_v5  ;;  %v1254_v33 = vmul.f32 %v1197_v10, %v131_v3  ;;  %v1278_v43 = vld [vmem:[#allocation3 + $0x58] sm:$0xff]  ;;  %v1281_v46 = vld [vmem:[#allocation6 + $0x8] ss:$0 sm:$0xff]  ;;  %v1292_v50 = vld [vmem:[#allocation3 + $0x60] sm:$0xff] }
  0x13   :  { %53 = vst [vmem:[#allocation2 + $0x1e0] sm:$0xff] %v1081_v0  ;;  %v1257_v34 = vmul.f32 %v1203_v13, %v132_v5  ;;  %v1260_v35 = vmul.f32 %v1205_v14, %v133_v8  ;;  %v1266_v39 = vmul.f32 %v1197_v10, %v132_v5  ;;  %v1269_v40 = vmul.f32 %v1203_v13, %v133_v8  ;;  %v1307_v57 = vld [vmem:[#allocation3 + $0x68] sm:$0xff]  ;;  %v1316_v63 = vld [vmem:[#allocation3 + $0x70] sm:$0xff] }
  0x14   :  { %54 = vst [vmem:[#allocation2 + $0x1e8] sm:$0x3] %v1081_v0  ;;  %v1272_v41 = vmul.f32 %v1205_v14, %v134_v9  ;;  %v1275_v42 = vmul.f32 %v1197_v10, %v133_v8  ;;  %v1285_v48 = vmul.f32 %v1203_v13, %v134_v9  ;;  %v1289_v49 = vmul.f32 %v1205_v14, %v1207_v16 }
  0x15   :  { %56 = vst [vmem:[#allocation2 + $0x90] sm:$0xff] %v1081_v0  ;;  %v430_v7 = vld [vmem:[#allocation2 + $0x1] sm:$0xff]  ;;  %v1296_v54 = vmul.f32 %v1197_v10, %v134_v9  ;;  %v1300_v55 = vmul.f32 %v1203_v13, %v1207_v16  ;;  %v1304_v56 = vmul.f32 %v1205_v14, %v1219_v21 }
  0x16   :  { %57 = vst [vmem:[#allocation2 + $0x98] sm:$0x3] %v1081_v0  ;;  %v665_v15 = vld [vmem:[#allocation2 + $0x2] sm:$0xff]  ;;  %v1213_v18 = vmul.f32 %v1197_v10, %v430_v7  ;;  %v1324_v7 = vld [vmem:[#allocation3 + $0x78] sm:$0xff] }
  0x17   :  { %58 = vst [vmem:[#allocation2 + $0x130] sm:$0xff] %v1081_v0  ;;  %v1236_v27 = vmul.f32 %v1215_v19, %v665_v15 }
  0x18   :  { %59 = vst [vmem:[#allocation2 + $0x138] sm:$0x3] %v1081_v0 }
  0x19   :  { %60 = vst [vmem:[#allocation2 + $0x1d0] sm:$0xff] %v1081_v0 }
  0x1a   :  { %61 = vst [vmem:[#allocation2 + $0x1d8] sm:$0x3] %v1081_v0 }
  0x1b   :  { %62 = vst [vmem:[#allocation2 + $0x270] sm:$0xff] %v1081_v0 }
  0x1c   :  { %63 = vst [vmem:[#allocation2 + $0x278] sm:$0x3] %v1081_v0 }
  0x1d   :  { %65 = vst [vmem:[#allocation2 + $0x10] sm:$0x1] %v1081_v0 }
  0x1e   :  { %66 = vst [vmem:[#allocation2 + $0x20] sm:$0x1] %v1081_v0 }
  0x1f   :  { %67 = vst [vmem:[#allocation2 + $0x30] sm:$0x1] %v1081_v0 }
  0x20   :  { %68 = vst [vmem:[#allocation2 + $0x40] sm:$0x1] %v1081_v0 }
  0x21   :  { %69 = vst [vmem:[#allocation2 + $0x50] sm:$0x1] %v1081_v0 }
  0x22   :  { %70 = vst [vmem:[#allocation2 + $0x60] sm:$0x1] %v1081_v0 }
  0x23   :  { %71 = vst [vmem:[#allocation2 + $0x70] sm:$0x1] %v1081_v0 }
  0x24   :  { %72 = vst [vmem:[#allocation2 + $0x80] sm:$0x1] %v1081_v0 }
  0x25   :  { %73 = vst [vmem:[#allocation2 + $0xb0] sm:$0x1] %v1081_v0 }
  0x26   :  { %74 = vst [vmem:[#allocation2 + $0xc0] sm:$0x1] %v1081_v0 }
  0x27   :  { %75 = vst [vmem:[#allocation2 + $0xd0] sm:$0x1] %v1081_v0 }
  0x28   :  { %76 = vst [vmem:[#allocation2 + $0xe0] sm:$0x1] %v1081_v0 }
  0x29   :  { %77 = vst [vmem:[#allocation2 + $0xf0] sm:$0x1] %v1081_v0 }
  0x2a   :  { %78 = vst [vmem:[#allocation2 + $0x100] sm:$0x1] %v1081_v0 }
  0x2b   :  { %79 = vst [vmem:[#allocation2 + $0x110] sm:$0x1] %v1081_v0 }
  0x2c   :  { %80 = vst [vmem:[#allocation2 + $0x120] sm:$0x1] %v1081_v0 }
  0x2d   :  { %81 = vst [vmem:[#allocation2 + $0x150] sm:$0x1] %v1081_v0 }
  0x2e   :  { %82 = vst [vmem:[#allocation2 + $0x160] sm:$0x1] %v1081_v0 }
  0x2f   :  { %83 = vst [vmem:[#allocation2 + $0x170] sm:$0x1] %v1081_v0 }
  0x30   :  { %84 = vst [vmem:[#allocation2 + $0x180] sm:$0x1] %v1081_v0 }
  0x31   :  { %85 = vst [vmem:[#allocation2 + $0x190] sm:$0x1] %v1081_v0 }
  0x32   :  { %86 = vst [vmem:[#allocation2 + $0x1a0] sm:$0x1] %v1081_v0 }
  0x33   :  { %87 = vst [vmem:[#allocation2 + $0x1b0] sm:$0x1] %v1081_v0 }
  0x34   :  { %88 = vst [vmem:[#allocation2 + $0x1c0] sm:$0x1] %v1081_v0 }
  0x35   :  { %89 = vst [vmem:[#allocation2 + $0x1f0] sm:$0x1] %v1081_v0 }
  0x36   :  { %90 = vst [vmem:[#allocation2 + $0x200] sm:$0x1] %v1081_v0 }
  0x37   :  { %91 = vst [vmem:[#allocation2 + $0x210] sm:$0x1] %v1081_v0 }
  0x38   :  { %92 = vst [vmem:[#allocation2 + $0x220] sm:$0x1] %v1081_v0 }
  0x39   :  { %93 = vst [vmem:[#allocation2 + $0x230] sm:$0x1] %v1081_v0 }
  0x3a   :  { %94 = vst [vmem:[#allocation2 + $0x240] sm:$0x1] %v1081_v0 }
  0x3b   :  { %95 = vst [vmem:[#allocation2 + $0x250] sm:$0x1] %v1081_v0 }
  0x3c   :  { %96 = vst [vmem:[#allocation2 + $0x260] sm:$0x1] %v1081_v0 }
  0x3d   :  { %97 = vst [vmem:[#allocation2 + $0x19] sm:$0x1] %v1081_v0 }
  0x3e   :  { %98 = vst [vmem:[#allocation2 + $0x29] sm:$0x1] %v1081_v0 }
  0x3f   :  { %99 = vst [vmem:[#allocation2 + $0x39] sm:$0x1] %v1081_v0 }
  0x40   :  { %100 = vst [vmem:[#allocation2 + $0x49] sm:$0x1] %v1081_v0 }
  0x41   :  { %101 = vst [vmem:[#allocation2 + $0x59] sm:$0x1] %v1081_v0 }
  0x42   :  { %102 = vst [vmem:[#allocation2 + $0x69] sm:$0x1] %v1081_v0 }
  0x43   :  { %103 = vst [vmem:[#allocation2 + $0x79] sm:$0x1] %v1081_v0 }
  0x44   :  { %104 = vst [vmem:[#allocation2 + $0x89] sm:$0x1] %v1081_v0 }
  0x45   :  { %105 = vst [vmem:[#allocation2 + $0xb9] sm:$0x1] %v1081_v0 }
  0x46   :  { %106 = vst [vmem:[#allocation2 + $0xc9] sm:$0x1] %v1081_v0 }
  0x47   :  { %107 = vst [vmem:[#allocation2 + $0xd9] sm:$0x1] %v1081_v0 }
  0x48   :  { %108 = vst [vmem:[#allocation2 + $0xe9] sm:$0x1] %v1081_v0 }
  0x49   :  { %109 = vst [vmem:[#allocation2 + $0xf9] sm:$0x1] %v1081_v0 }
  0x4a   :  { %110 = vst [vmem:[#allocation2 + $0x109] sm:$0x1] %v1081_v0 }
  0x4b   :  { %111 = vst [vmem:[#allocation2 + $0x119] sm:$0x1] %v1081_v0 }
  0x4c   :  { %112 = vst [vmem:[#allocation2 + $0x129] sm:$0x1] %v1081_v0 }
  0x4d   :  { %113 = vst [vmem:[#allocation2 + $0x159] sm:$0x1] %v1081_v0 }
  0x4e   :  { %114 = vst [vmem:[#allocation2 + $0x169] sm:$0x1] %v1081_v0 }
  0x4f   :  { %115 = vst [vmem:[#allocation2 + $0x179] sm:$0x1] %v1081_v0 }
  0x50   :  { %116 = vst [vmem:[#allocation2 + $0x189] sm:$0x1] %v1081_v0 }
  0x51   :  { %117 = vst [vmem:[#allocation2 + $0x199] sm:$0x1] %v1081_v0 }
  0x52   :  { %118 = vst [vmem:[#allocation2 + $0x1a9] sm:$0x1] %v1081_v0 }
  0x53   :  { %119 = vst [vmem:[#allocation2 + $0x1b9] sm:$0x1] %v1081_v0 }
  0x54   :  { %120 = vst [vmem:[#allocation2 + $0x1c9] sm:$0x1] %v1081_v0 }
  0x55   :  { %121 = vst [vmem:[#allocation2 + $0x1f9] sm:$0x1] %v1081_v0 }
  0x56   :  { %122 = vst [vmem:[#allocation2 + $0x209] sm:$0x1] %v1081_v0 }
  0x57   :  { %123 = vst [vmem:[#allocation2 + $0x219] sm:$0x1] %v1081_v0 }
  0x58   :  { %124 = vst [vmem:[#allocation2 + $0x229] sm:$0x1] %v1081_v0 }
  0x59   :  { %125 = vst [vmem:[#allocation2 + $0x239] sm:$0x1] %v1081_v0 }
  0x5a   :  { %126 = vst [vmem:[#allocation2 + $0x249] sm:$0x1] %v1081_v0 }
  0x5b   :  { %127 = vst [vmem:[#allocation2 + $0x259] sm:$0x1] %v1081_v0 }
  0x5c   :  { %128 = vst [vmem:[#allocation2 + $0x269] sm:$0x1] %v1081_v0 }
  0x5d   :  { %161 = vst [vmem:[#allocation2 + $0x11] sm:$0xff] %v129_v1 }
  0x5e   :  { %162 = vst [vmem:[#allocation2 + $0x21] sm:$0xff] %v130_v2 }
  0x5f   :  { %163 = vst [vmem:[#allocation2 + $0x31] sm:$0xff] %v131_v3 }
  0x60   :  { %164 = vst [vmem:[#allocation2 + $0x41] sm:$0xff] %v132_v5 }
  0x61   :  { %165 = vst [vmem:[#allocation2 + $0x51] sm:$0xff] %v133_v8 }
  0x62   :  { %166 = vst [vmem:[#allocation2 + $0x61] sm:$0xff] %v134_v9 }
  0x63   :  { %167 = vst [vmem:[#allocation2 + $0x71] sm:$0xff] %v1207_v16 }
  0x64   :  { %1766 = vst [vmem:[#allocation12_spill] sm:$0xff] %v1248_v31  ;;  %v196_v37 = vld [vmem:[#allocation2 + $0x10] sm:$0xff] }
  0x65   :  { %168 = vst [vmem:[#allocation2 + $0x81] sm:$0xff] %v1219_v21  ;;  %v666_v38 = vld [vmem:[#allocation2 + $0x12] sm:$0xff]  ;;  %v197_v44 = vld [vmem:[#allocation2 + $0x20] sm:$0xff]  ;;  %v301_v45 = vmul.f32 %v1199_v11, %v196_v37  ;;  %v237_v47 = vmul.f32 %v1195_v6, %v196_v37 }
  0x66   :  { %1767 = vst [vmem:[#allocation13_spill] sm:$0xff] %v1263_v36  ;;  %v667_v51 = vld [vmem:[#allocation2 + $0x22] sm:$0xff]  ;;  %v198_v52 = vld [vmem:[#allocation2 + $0x30] sm:$0xff]  ;;  %v302_v53 = vmul.f32 %v1199_v11, %v197_v44  ;;  %v366_v59 = vmul.f32 %v1201_v12, %v197_v44  ;;  %v1312_v60 = vmul.f32 %v1217_v20, %v666_v38  ;;  %v238_v62 = vmul.f32 %v1195_v6, %v197_v44 }
  0x67   :  { %169 = vst [vmem:[#allocation2 + $0xb1] sm:$0xff] %v1233_v26  ;;  %v333_v58 = vadd.f32 %v301_v45, %v1210_v17  ;;  %v199_v61 = vld [vmem:[#allocation2 + $0x40] sm:$0xff]  ;;  %v367_v1 = vmul.f32 %v1201_v12, %v198_v52  ;;  %v668_v2 = vld [vmem:[#allocation2 + $0x32] sm:$0xff]  ;;  %v1320_v3 = vmul.f32 %v1215_v19, %v666_v38  ;;  %v303_v4 = vmul.f32 %v1199_v11, %v198_v52 }
  0x68   :  { %1768 = vst [vmem:[#allocation14_spill] sm:$0xff] %v1278_v43  ;;  %v334_v0 = vadd.f32 %v302_v53, %v237_v47  ;;  %v200_v5 = vld [vmem:[#allocation2 + $0x50] sm:$0xff]  ;;  %v1327_v9 = vmul.f32 %v1281_v46, %v667_v51  ;;  %v1330_v15 = vmul.f32 %v1217_v20, %v667_v51  ;;  %v239_v37 = vmul.f32 %v1195_v6, %v198_v52  ;;  %v1334_v38 = vld [vmem:[#allocation3 + $0x80] sm:$0xff] }
  0x69   :  { %170 = vst [vmem:[#allocation2 + $0xc1] sm:$0xff] %v1248_v31  ;;  %v398_v8 = vadd.f32 %v366_v59, %v333_v58  ;;  %v335_v45 = vadd.f32 %v303_v4, %v238_v62  ;;  %v368_v47 = vmul.f32 %v1201_v12, %v199_v61  ;;  %v669_v53 = vld [vmem:[#allocation2 + $0x42] sm:$0xff]  ;;  %v708_v52 = vmul.f32 %v1215_v19, %v667_v51  ;;  %v1348_v62 = vld [vmem:[#allocation3 + $0x90] sm:$0xff] }
  0x6a   :  { %1769 = vst [vmem:[#allocation15_spill] sm:$0xff] %v1292_v50  ;;  %v399_v44 = vadd.f32 %v367_v1, %v334_v0  ;;  %v1339_v58 = vld [vmem:[#allocation3 + $0x88] sm:$0xff]  ;;  %v773_v51 = vmul.f32 %v1217_v20, %v668_v2  ;;  %v1358_v31 = vmul.f32 %v1281_v46, %v669_v53 }
  0x6b   :  { %171 = vst [vmem:[#allocation2 + $0xd1] sm:$0xff] %v1263_v36  ;;  %v503_v59 = vadd.f32 %v1213_v18, %v398_v8  ;;  %v400_v1 = vadd.f32 %v368_v47, %v335_v45  ;;  %v240_v36 = vmul.f32 %v1195_v6, %v199_v61  ;;  %v1353_v18 = vld [vmem:[#allocation3 + $0x98] sm:$0xff]  ;;  %v1367_v45 = vld [vmem:[#allocation2 + $0x70] sm:$0xff] }
  0x6c   :  { %1770 = vst [vmem:[#allocation16_spill] sm:$0xff] %v1307_v57  ;;  %v504_v0 = vadd.f32 %v1228_v24, %v399_v44  ;;  %v1362_v24 = vld [vmem:[#allocation3 + $0xa0] sm:$0xff]  ;;  %v709_v44 = vmul.f32 %v1215_v19, %v668_v2 }
  0x6d   :  { %172 = vst [vmem:[#allocation2 + $0xe1] sm:$0xff] %v1278_v43  ;;  %v1343_v43 = vmul.f32 %v1281_v46, %v668_v2  ;;  %v568_v8 = vadd.f32 %v1222_v22, %v503_v59  ;;  %v1370_v22 = vld [vmem:[#allocation3 + $0xa8] sm:$0xff] }
  0x6e   :  { %1771 = vst [vmem:[#allocation17_spill] sm:$0xff] %v1316_v63 }
  0x6f   :  { %173 = vst [vmem:[#allocation2 + $0xf1] sm:$0xff] %v1292_v50  ;;  %v304_v50 = vmul.f32 %v1199_v11, %v199_v61  ;;  %v505_v61 = vadd.f32 %v1231_v25, %v400_v1  ;;  %v633_v47 = vadd.f32 %v1225_v23, %v568_v8  ;;  %v152_v23 = vld [vmem:[#allocation3 + $0xb8] sm:$0xff] }
  0x70   :  { %1772 = vst [vmem:[#allocation18_spill] sm:$0xff] %v1324_v7 }
  0x71   :  { %174 = vst [vmem:[#allocation2 + $0x101] sm:$0xff] %v1307_v57  ;;  %v369_v57 = vmul.f32 %v1201_v12, %v200_v5  ;;  %v336_v4 = vadd.f32 %v304_v50, %v239_v37  ;;  %v569_v50 = vadd.f32 %v1239_v28, %v504_v0  ;;  %v151_v28 = vld [vmem:[#allocation3 + $0xb0] sm:$0xff] }
  0x72   :  { %1773 = vst [vmem:[#allocation19_spill] sm:$0xff] %v1334_v38  ;;  %v670_v0 = vld [vmem:[#allocation2 + $0x52] sm:$0xff] }
  0x73   :  { %175 = vst [vmem:[#allocation2 + $0x111] sm:$0xff] %v1316_v63  ;;  %v201_v63 = vld [vmem:[#allocation2 + $0x60] sm:$0xff]  ;;  %v401_v37 = vadd.f32 %v369_v57, %v336_v4  ;;  %v634_v25 = vadd.f32 %v1242_v29, %v569_v50  ;;  %v570_v57 = vadd.f32 %v1245_v30, %v505_v61  ;;  %v371_v4 = vmul.f32 %v1201_v12, %v1367_v45  ;;  %v154_v61 = vld [vmem:[#allocation3 + $0xc8] sm:$0xff] }
  0x74   :  { %1774 = vst [vmem:[#allocation20_spill] sm:$0xff] %v1339_v58  ;;  %v306_v1 = vmul.f32 %v1199_v11, %v201_v63  ;;  %v153_v29 = vld [vmem:[#allocation3 + $0xc0] sm:$0xff] }
  0x75   :  { %176 = vst [vmem:[#allocation2 + $0x121] sm:$0xff] %v1324_v7  ;;  %v305_v7 = vmul.f32 %v1199_v11, %v200_v5  ;;  %v506_v2 = vadd.f32 %v1254_v33, %v401_v37  ;;  %v739_v30 = vadd.f32 %v1320_v3, %v634_v25  ;;  %v635_v33 = vadd.f32 %v1251_v32, %v570_v57 }
  0x76   :  { %177 = vst [vmem:[#allocation2 + $0x151] sm:$0xff] %v1334_v38  ;;  %v241_v38 = vmul.f32 %v1195_v6, %v200_v5  ;;  %v839_v37 = vmul.f32 %v1281_v46, %v670_v0  ;;  %v242_v57 = vmul.f32 %v1195_v6, %v201_v63 }
  0x77   :  { %178 = vst [vmem:[#allocation2 + $0x161] sm:$0xff] %v1339_v58  ;;  %v337_v59 = vadd.f32 %v305_v7, %v240_v36  ;;  %v370_v58 = vmul.f32 %v1201_v12, %v201_v63  ;;  %v738_v36 = vadd.f32 %v1236_v27, %v633_v47  ;;  %v774_v7 = vmul.f32 %v1217_v20, %v669_v53 }
  0x78   :  { %179 = vst [vmem:[#allocation2 + $0x171] sm:$0xff] %v1348_v62  ;;  %v571_v8 = vadd.f32 %v1257_v34, %v506_v2  ;;  %v338_v50 = vadd.f32 %v306_v1, %v241_v38  ;;  %v710_v47 = vmul.f32 %v1215_v19, %v669_v53  ;;  %v740_v3 = vadd.f32 %v708_v52, %v635_v33  ;;  %v203_v34 = vld [vmem:[#allocation2 + $0x80] sm:$0xff]  ;;  %v156_v38 = vld [vmem:[#allocation3 + $0xd8] sm:$0xff] }
  0x79   :  { %1775 = vst [vmem:[#allocation21_spill] sm:$0xff] %v1370_v22  ;;  %v402_v5 = vadd.f32 %v370_v58, %v337_v59  ;;  %v803_v27 = vadd.f32 %v1312_v60, %v738_v36  ;;  %v155_v59 = vld [vmem:[#allocation3 + $0xd0] sm:$0xff]  ;;  %v1399_v60 = vld [vmem:[%s1744_s2] ss:$0 sm:$0xff]  ;;  %v671_v53 = vld [vmem:[#allocation2 + $0x62] sm:$0xff]  ;;  %v372_v63 = vmul.f32 %v1201_v12, %v203_v34 }
  0x7a   :  { %180 = vst [vmem:[#allocation2 + $0x181] sm:$0xff] %v1353_v18  ;;  %v636_v32 = vadd.f32 %v1260_v35, %v571_v8  ;;  %v403_v25 = vadd.f32 %v371_v4, %v338_v50  ;;  %v157_v35 = vld [vmem:[#allocation3 + $0xe0] sm:$0xff]  ;;  %v805_v2 = vadd.f32 %v773_v51, %v740_v3  ;;  %v159_v4 = vld [vmem:[#allocation3 + $0xf0] sm:$0xff]  ;;  %v776_v3 = vmul.f32 %v1217_v20, %v671_v53 }
  0x7b   :  { %181 = vst [vmem:[#allocation2 + $0x191] sm:$0xff] %v1362_v24  ;;  %v507_v58 = vadd.f32 %v1266_v39, %v402_v5 }
  0x7c   :  { %182 = vst [vmem:[#allocation2 + $0x1a1] sm:$0xff] %v1370_v22  ;;  %v804_v22 = vadd.f32 %v1330_v15, %v739_v30  ;;  %v307_v15 = vmul.f32 %v1199_v11, %v1367_v45  ;;  %v741_v1 = vadd.f32 %v709_v44, %v636_v32 }
  0x7d   :  { %183 = vst [vmem:[#allocation2 + $0x1b1] sm:$0xff] %v151_v28  ;;  %v868_v28 = vadd.f32 %v1327_v9, %v803_v27  ;;  %v572_v39 = vadd.f32 %v1269_v40, %v507_v58  ;;  %v508_v9 = vadd.f32 %v1275_v42, %v403_v25  ;;  %v775_v40 = vmul.f32 %v1217_v20, %v670_v0  ;;  %v160_v42 = vld [vmem:[#allocation3 + $0xf8] sm:$0xff]  ;;  %v673_v25 = vld [vmem:[#allocation2 + $0x82] sm:$0xff] }
  0x7e   :  { %184 = vst [vmem:[#allocation2 + $0x1c1] sm:$0xff] %v152_v23  ;;  %v869_v52 = vadd.f32 %v1343_v43, %v804_v22  ;;  %v158_v23 = vld [vmem:[#allocation3 + $0xe8] sm:$0xff]  ;;  %v339_v5 = vadd.f32 %v307_v15, %v242_v57  ;;  %v806_v30 = vadd.f32 %v774_v7, %v741_v1  ;;  %v840_v43 = vmul.f32 %v1281_v46, %v671_v53  ;;  %v672_v27 = vld [vmem:[#allocation2 + $0x72] sm:$0xff] }
  0x7f   :  { %185 = vst [vmem:[#allocation2 + $0x1f1] sm:$0xff] %v153_v29  ;;  %v637_v36 = vadd.f32 %v1272_v41, %v572_v39  ;;  %v870_v29 = vadd.f32 %v1358_v31, %v805_v2  ;;  %v573_v51 = vadd.f32 %v1285_v48, %v508_v9  ;;  %v904_v44 = vadd.f32 %v1399_v60, %v868_v28  ;;  %v439_v57 = vld [vmem:[#allocation2 + $0x91] sm:$0xff]  ;;  %v207_v2 = vld [vmem:[#allocation2 + $0xc0] sm:$0xff] }
  0x80   :  { %186 = vst [vmem:[#allocation2 + $0x201] sm:$0xff] %v154_v61  ;;  %v711_v41 = vmul.f32 %v1215_v19, %v670_v0  ;;  %v404_v33 = vadd.f32 %v372_v63, %v339_v5  ;;  %v905_v8 = vadd.f32 %v1399_v60, %v869_v52  ;;  %v871_v61 = vadd.f32 %v839_v37, %v806_v30  ;;  %v674_v5 = vld [vmem:[#allocation2 + $0x92] sm:$0xff] }
  0x81   :  { %187 = vst [vmem:[#allocation2 + $0x211] sm:$0xff] %v155_v59  ;;  %v742_v22 = vadd.f32 %v710_v47, %v637_v36  ;;  %v906_v50 = vadd.f32 %v1399_v60, %v870_v29  ;;  %v638_v31 = vadd.f32 %v1289_v49, %v573_v51  ;;  %v243_v58 = vmul.f32 %v1195_v6, %v1367_v45 }
  0x82   :  { %188 = vst [vmem:[#allocation2 + $0x221] sm:$0xff] %v156_v38  ;;  %v509_v48 = vadd.f32 %v1296_v54, %v404_v33  ;;  %v308_v47 = vmul.f32 %v1199_v11, %v203_v34  ;;  %v907_v0 = vadd.f32 %v1399_v60, %v871_v61  ;;  %v1425_v37 = vmul.f32 0.0, %v1201_v12  ;;  %v206_v38 = vld [vmem:[#allocation2 + $0xb0] sm:$0xff] }
  0x83   :  { %189 = vst [vmem:[#allocation2 + $0x231] sm:$0xff] %v157_v35  ;;  %v807_v7 = vadd.f32 %v775_v40, %v742_v22  ;;  %v743_v59 = vadd.f32 %v711_v41, %v638_v31  ;;  %v478_v45 = vmul.f32 %v1197_v10, %v1207_v16  ;;  %v841_v28 = vmul.f32 %v1281_v46, %v672_v27  ;;  %v440_v16 = vld [vmem:[#allocation2 + $0xa1] sm:$0xff]  ;;  %v208_v22 = vld [vmem:[#allocation2 + $0xd0] sm:$0xff] }
  0x84   :  { %190 = vst [vmem:[#allocation2 + $0x241] sm:$0xff] %v158_v23  ;;  %v574_v32 = vadd.f32 %v1300_v55, %v509_v48  ;;  %v340_v54 = vadd.f32 %v308_v47, %v243_v58  ;;  %v712_v39 = vmul.f32 %v1215_v19, %v671_v53  ;;  %v543_v52 = vmul.f32 %v1203_v13, %v1219_v21  ;;  %v676_v61 = vld [vmem:[#allocation2 + $0xb2] sm:$0xff] }
  0x85   :  { %191 = vst [vmem:[#allocation2 + $0x251] sm:$0xff] %v159_v4  ;;  %v872_v49 = vadd.f32 %v840_v43, %v807_v7  ;;  %v808_v34 = vadd.f32 %v776_v3, %v743_v59  ;;  %v777_v9 = vmul.f32 %v1217_v20, %v672_v27  ;;  %v842_v23 = vmul.f32 %v1281_v46, %v673_v25  ;;  %v675_v43 = vld [vmem:[#allocation2 + $0xa2] sm:$0xff]  ;;  %v1776_v48 = vld [vmem:[#allocation12_spill] sm:$0xff] }
  0x86   :  { %192 = vst [vmem:[#allocation2 + $0x261] sm:$0xff] %v160_v42  ;;  %v639_v35 = vadd.f32 %v1304_v56, %v574_v32  ;;  %v405_v55 = vadd.f32 %v1425_v37, %v340_v54  ;;  %v309_v53 = vmul.f32 %v1199_v11, %v206_v38  ;;  %v608_v56 = vmul.f32 %v1205_v14, %v439_v57  ;;  %v677_v59 = vld [vmem:[#allocation2 + $0xc2] sm:$0xff] }
  0x87   :  { %936 = vst [vmem:[#allocation8] sm:$0xff] %v904_v44  ;;  %v908_v15 = vadd.f32 %v1399_v60, %v872_v49  ;;  %v873_v1 = vadd.f32 %v841_v28, %v808_v34  ;;  %v713_v63 = vmul.f32 %v1215_v19, %v672_v27  ;;  %v374_v29 = vmul.f32 %v1201_v12, %v207_v2 }
  0x88   :  { %937 = vst [vmem:[#allocation8 + $0x8] sm:$0xff] %v905_v8  ;;  %v744_v36 = vadd.f32 %v712_v39, %v639_v35  ;;  %v510_v40 = vadd.f32 %v478_v45, %v405_v55  ;;  %v341_v4 = vadd.f32 %v309_v53, %v1210_v17  ;;  %v479_v30 = vmul.f32 %v1197_v10, %v440_v16  ;;  %v210_v53 = vld [vmem:[#allocation2 + $0xf0] sm:$0xff] }
  0x89   :  { %938 = vst [vmem:[#allocation8 + $0x10] sm:$0xff] %v906_v50  ;;  %v909_v21 = vadd.f32 %v1399_v60, %v873_v1  ;;  %v778_v44 = vmul.f32 %v1217_v20, %v673_v25  ;;  %v245_v41 = vmul.f32 %v1195_v6, %v206_v38  ;;  %v843_v33 = vmul.f32 %v1281_v46, %v674_v5  ;;  %v209_v25 = vld [vmem:[#allocation2 + $0xe0] sm:$0xff] }
  0x8a   :  { %939 = vst [vmem:[#allocation8 + $0x18] sm:$0xff] %v907_v0  ;;  %v809_v51 = vadd.f32 %v777_v9, %v744_v36  ;;  %v575_v42 = vadd.f32 %v543_v52, %v510_v40  ;;  %v406_v8 = vadd.f32 %v374_v29, %v341_v4  ;;  %v544_v50 = vmul.f32 %v1203_v13, %v1233_v26  ;;  %v678_v4 = vld [vmem:[#allocation2 + $0xd2] sm:$0xff] }
  0x8b   :  { %940 = vst [vmem:[#allocation8 + $0x20] sm:$0xff] %v908_v15  ;;  %v310_v31 = vmul.f32 %v1199_v11, %v207_v2  ;;  %v609_v58 = vmul.f32 %v1205_v14, %v1776_v48  ;;  %v714_v47 = vmul.f32 %v1215_v19, %v675_v43  ;;  %v375_v49 = vmul.f32 %v1201_v12, %v208_v22 }
  0x8c   :  { %941 = vst [vmem:[#allocation8 + $0x28] sm:$0xff] %v909_v21  ;;  %v874_v7 = vadd.f32 %v842_v23, %v809_v51  ;;  %v640_v27 = vadd.f32 %v608_v56, %v575_v42  ;;  %v511_v0 = vadd.f32 %v479_v30, %v406_v8  ;;  %v480_v32 = vmul.f32 %v1197_v10, %v1233_v26  ;;  %v1777_v26 = vld [vmem:[#allocation13_spill] sm:$0xff]  ;;  %v1778_v51 = vld [vmem:[#allocation14_spill] sm:$0xff] }
  0x8d   :  { %v342_v3 = vadd.f32 %v310_v31, %v245_v41  ;;  %v779_v38 = vmul.f32 %v1217_v20, %v676_v61  ;;  %v246_v34 = vmul.f32 %v1195_v6, %v207_v2  ;;  %v545_v57 = vmul.f32 %v1203_v13, %v1776_v48 }
  0x8e   :  { %v910_v54 = vadd.f32 %v1399_v60, %v874_v7  ;;  %v745_v45 = vadd.f32 %v713_v63, %v640_v27  ;;  %v576_v28 = vadd.f32 %v544_v50, %v511_v0  ;;  %v311_v15 = vmul.f32 %v1199_v11, %v208_v22  ;;  %v679_v0 = vld [vmem:[#allocation2 + $0xe2] sm:$0xff] }
  0x8f   :  { %v407_v39 = vadd.f32 %v375_v49, %v342_v3  ;;  %v844_v55 = vmul.f32 %v1281_v46, %v677_v59  ;;  %v610_v52 = vmul.f32 %v1205_v14, %v1777_v26  ;;  %v376_v16 = vmul.f32 %v1201_v12, %v209_v25  ;;  %v211_v49 = vld [vmem:[#allocation2 + $0x100] sm:$0xff] }
  0x90   :  { %942 = vst [vmem:[#allocation8 + $0x30] sm:$0xff] %v910_v54  ;;  %v810_v35 = vadd.f32 %v778_v44, %v745_v45  ;;  %v641_v1 = vadd.f32 %v609_v58, %v576_v28  ;;  %v343_v23 = vadd.f32 %v311_v15, %v246_v34  ;;  %v481_v2 = vmul.f32 %v1197_v10, %v1776_v48  ;;  %v1779_v54 = vld [vmem:[#allocation15_spill] sm:$0xff] }
  0x91   :  { %v512_v9 = vadd.f32 %v480_v32, %v407_v39  ;;  %v715_v40 = vmul.f32 %v1215_v19, %v676_v61  ;;  %v546_v56 = vmul.f32 %v1203_v13, %v1777_v26  ;;  %v247_v5 = vmul.f32 %v1195_v6, %v208_v22 }
  0x92   :  { %v875_v36 = vadd.f32 %v843_v33, %v810_v35  ;;  %v746_v63 = vadd.f32 %v714_v47, %v641_v1  ;;  %v408_v29 = vadd.f32 %v376_v16, %v343_v23  ;;  %v312_v30 = vmul.f32 %v1199_v11, %v209_v25  ;;  %v680_v23 = vld [vmem:[#allocation2 + $0xf2] sm:$0xff] }
  0x93   :  { %v577_v21 = vadd.f32 %v545_v57, %v512_v9  ;;  %v611_v42 = vmul.f32 %v1205_v14, %v1778_v51  ;;  %v377_v44 = vmul.f32 %v1201_v12, %v210_v53  ;;  %v482_v41 = vmul.f32 %v1197_v10, %v1777_v26  ;;  %v212_v9 = vld [vmem:[#allocation2 + $0x110] sm:$0xff] }
  0x94   :  { %v911_v43 = vadd.f32 %v1399_v60, %v875_v36  ;;  %v811_v33 = vadd.f32 %v779_v38, %v746_v63  ;;  %v513_v50 = vadd.f32 %v481_v2, %v408_v29  ;;  %v344_v22 = vadd.f32 %v312_v30, %v247_v5  ;;  %v1780_v29 = vld [vmem:[#allocation16_spill] sm:$0xff] }
  0x95   :  { %v642_v8 = vadd.f32 %v610_v52, %v577_v21  ;;  %v780_v61 = vmul.f32 %v1217_v20, %v677_v59  ;;  %v845_v31 = vmul.f32 %v1281_v46, %v678_v4  ;;  %v716_v7 = vmul.f32 %v1215_v19, %v677_v59 }
  0x96   :  { %943 = vst [vmem:[#allocation8 + $0x38] sm:$0xff] %v911_v43  ;;  %v547_v27 = vmul.f32 %v1203_v13, %v1778_v51  ;;  %v876_v48 = vadd.f32 %v844_v55, %v811_v33  ;;  %v578_v47 = vadd.f32 %v546_v56, %v513_v50  ;;  %v409_v3 = vadd.f32 %v377_v44, %v344_v22 }
  0x97   :  { %v747_v58 = vadd.f32 %v715_v40, %v642_v8  ;;  %v781_v32 = vmul.f32 %v1217_v20, %v678_v4  ;;  %v612_v45 = vmul.f32 %v1205_v14, %v1779_v54  ;;  %v248_v38 = vmul.f32 %v1195_v6, %v209_v25 }
  0x98   :  { %v313_v34 = vmul.f32 %v1199_v11, %v210_v53  ;;  %v912_v59 = vadd.f32 %v1399_v60, %v876_v48  ;;  %v643_v39 = vadd.f32 %v611_v42, %v578_v47  ;;  %v514_v57 = vadd.f32 %v482_v41, %v409_v3  ;;  %v681_v48 = vld [vmem:[#allocation2 + $0x102] sm:$0xff] }
  0x99   :  { %v812_v28 = vadd.f32 %v780_v61, %v747_v58  ;;  %v846_v15 = vmul.f32 %v1281_v46, %v679_v0  ;;  %v378_v55 = vmul.f32 %v1201_v12, %v211_v49  ;;  %v483_v26 = vmul.f32 %v1197_v10, %v1778_v51 }
  0x9a   :  { %v345_v35 = vadd.f32 %v313_v34, %v248_v38  ;;  %944 = vst [vmem:[#allocation8 + $0x40] sm:$0xff] %v912_v59  ;;  %v748_v16 = vadd.f32 %v716_v7, %v643_v39  ;;  %v579_v1 = vadd.f32 %v547_v27, %v514_v57  ;;  %v717_v25 = vmul.f32 %v1215_v19, %v678_v4 }
  0x9b   :  { %v877_v52 = vadd.f32 %v845_v31, %v812_v28  ;;  %v548_v36 = vmul.f32 %v1203_v13, %v1779_v54  ;;  %v249_v40 = vmul.f32 %v1195_v6, %v210_v53  ;;  %v314_v56 = vmul.f32 %v1199_v11, %v211_v49  ;;  %v213_v31 = vld [vmem:[#allocation2 + $0x120] sm:$0xff] }
  0x9c   :  { %v410_v2 = vadd.f32 %v378_v55, %v345_v35  ;;  %v813_v63 = vadd.f32 %v781_v32, %v748_v16  ;;  %v644_v21 = vadd.f32 %v612_v45, %v579_v1  ;;  %v613_v30 = vmul.f32 %v1205_v14, %v1780_v29  ;;  %v1781_v45 = vld [vmem:[#allocation17_spill] sm:$0xff] }
  0x9d   :  { %v913_v5 = vadd.f32 %v1399_v60, %v877_v52  ;;  %v346_v51 = vadd.f32 %v314_v56, %v249_v40  ;;  %v379_v4 = vmul.f32 %v1201_v12, %v212_v9  ;;  %v484_v42 = vmul.f32 %v1197_v10, %v1779_v54  ;;  %v216_v56 = vld [vmem:[#allocation2 + $0x150] sm:$0xff] }
  0x9e   :  { %v515_v43 = vadd.f32 %v483_v26, %v410_v2  ;;  %v878_v44 = vadd.f32 %v846_v15, %v813_v63  ;;  %v749_v41 = vadd.f32 %v717_v25, %v644_v21  ;;  %v782_v53 = vmul.f32 %v1217_v20, %v679_v0  ;;  %v682_v15 = vld [vmem:[#allocation2 + $0x112] sm:$0xff]  ;;  %v1782_v63 = vld [vmem:[#allocation18_spill] sm:$0xff] }
  0x9f   :  { %945 = vst [vmem:[#allocation8 + $0x48] sm:$0xff] %v913_v5  ;;  %v847_v33 = vmul.f32 %v1281_v46, %v680_v23  ;;  %v718_v50 = vmul.f32 %v1215_v19, %v679_v0  ;;  %v411_v22 = vadd.f32 %v379_v4, %v346_v51  ;;  %v549_v61 = vmul.f32 %v1203_v13, %v1780_v29  ;;  %v217_v4 = vld [vmem:[#allocation2 + $0x160] sm:$0xff] }
  0xa0   :  { %v580_v8 = vadd.f32 %v548_v36, %v515_v43  ;;  %v914_v7 = vadd.f32 %v1399_v60, %v878_v44  ;;  %v814_v27 = vadd.f32 %v782_v53, %v749_v41  ;;  %v250_v58 = vmul.f32 %v1195_v6, %v211_v49  ;;  %v683_v36 = vld [vmem:[#allocation2 + $0x122] sm:$0xff] }
  0xa1   :  { %v315_v47 = vmul.f32 %v1199_v11, %v212_v9  ;;  %v783_v32 = vmul.f32 %v1217_v20, %v680_v23  ;;  %v516_v54 = vadd.f32 %v484_v42, %v411_v22  ;;  %v614_v0 = vmul.f32 %v1205_v14, %v1781_v45  ;;  %v450_v42 = vld [vmem:[#allocation2 + $0x141] sm:$0xff] }
  0xa2   :  { %v645_v3 = vadd.f32 %v613_v30, %v580_v8  ;;  %946 = vst [vmem:[#allocation8 + $0x50] sm:$0xff] %v914_v7  ;;  %v879_v38 = vadd.f32 %v847_v33, %v814_v27  ;;  %v380_v59 = vmul.f32 %v1201_v12, %v213_v31  ;;  %v485_v28 = vmul.f32 %v1197_v10, %v1780_v29  ;;  %v449_v33 = vld [vmem:[#allocation2 + $0x131] sm:$0xff] }
  0xa3   :  { %v347_v34 = vadd.f32 %v315_v47, %v250_v58  ;;  %v848_v49 = vmul.f32 %v1281_v46, %v681_v48  ;;  %v581_v57 = vadd.f32 %v549_v61, %v516_v54  ;;  %v719_v35 = vmul.f32 %v1215_v19, %v680_v23  ;;  %v684_v54 = vld [vmem:[#allocation2 + $0x132] sm:$0xff] }
  0xa4   :  { %v750_v39 = vadd.f32 %v718_v50, %v645_v3  ;;  %v915_v55 = vadd.f32 %v1399_v60, %v879_v38  ;;  %v550_v52 = vmul.f32 %v1203_v13, %v1781_v45  ;;  %v251_v16 = vmul.f32 %v1195_v6, %v212_v9 }
  0xa5   :  { %v412_v26 = vadd.f32 %v380_v59, %v347_v34  ;;  %v646_v25 = vadd.f32 %v614_v0, %v581_v57  ;;  %v784_v2 = vmul.f32 %v1217_v20, %v681_v48  ;;  %v316_v40 = vmul.f32 %v1199_v11, %v213_v31  ;;  %v1783_v34 = vld [vmem:[#allocation19_spill] sm:$0xff] }
  0xa6   :  { %v815_v1 = vadd.f32 %v783_v32, %v750_v39  ;;  %947 = vst [vmem:[#allocation8 + $0x58] sm:$0xff] %v915_v55  ;;  %v849_v5 = vmul.f32 %v1281_v46, %v682_v15  ;;  %v615_v21 = vmul.f32 %v1205_v14, %v1782_v63  ;;  %v720_v29 = vmul.f32 %v1215_v19, %v681_v48 }
  0xa7   :  { %v517_v23 = vadd.f32 %v485_v28, %v412_v26  ;;  %v751_v43 = vadd.f32 %v719_v35, %v646_v25  ;;  %v348_v9 = vadd.f32 %v316_v40, %v251_v16  ;;  %v486_v51 = vmul.f32 %v1197_v10, %v1781_v45  ;;  %v218_v28 = vld [vmem:[#allocation2 + $0x170] sm:$0xff]  ;;  %v685_v35 = vld [vmem:[#allocation2 + $0x142] sm:$0xff] }
  0xa8   :  { %v880_v30 = vadd.f32 %v848_v49, %v815_v1  ;;  %v785_v41 = vmul.f32 %v1217_v20, %v682_v15  ;;  %v850_v53 = vmul.f32 %v1281_v46, %v683_v36  ;;  %v317_v8 = vmul.f32 %v1199_v11, %v216_v56  ;;  %v1784_v16 = vld [vmem:[#allocation20_spill] sm:$0xff] }
  0xa9   :  { %v582_v44 = vadd.f32 %v550_v52, %v517_v23  ;;  %v816_v22 = vadd.f32 %v784_v2, %v751_v43  ;;  %v413_v61 = vadd.f32 %v1425_v37, %v348_v9  ;;  %v551_v31 = vmul.f32 %v1203_v13, %v1782_v63  ;;  %v687_v43 = vld [vmem:[#allocation2 + $0x162] sm:$0xff] }
  0xaa   :  { %v916_v50 = vadd.f32 %v1399_v60, %v880_v30  ;;  %v349_v27 = vadd.f32 %v317_v8, %v1210_v17  ;;  %v382_v48 = vmul.f32 %v1201_v12, %v217_v4  ;;  %v487_v58 = vmul.f32 %v1197_v10, %v450_v42  ;;  %v686_v30 = vld [vmem:[#allocation2 + $0x152] sm:$0xff] }
  0xab   :  { %v647_v7 = vadd.f32 %v615_v21, %v582_v44  ;;  %v881_v47 = vadd.f32 %v849_v5, %v816_v22  ;;  %v518_v3 = vadd.f32 %v486_v51, %v413_v61  ;;  %v616_v32 = vmul.f32 %v1205_v14, %v449_v33  ;;  %v219_v5 = vld [vmem:[#allocation2 + $0x180] sm:$0xff] }
  0xac   :  { %948 = vst [vmem:[#allocation8 + $0x60] sm:$0xff] %v916_v50  ;;  %v721_v45 = vmul.f32 %v1215_v19, %v682_v15  ;;  %v414_v38 = vadd.f32 %v382_v48, %v349_v27  ;;  %v552_v59 = vmul.f32 %v1203_v13, %v1783_v34  ;;  %v253_v17 = vmul.f32 %v1195_v6, %v216_v56 }
  0xad   :  { %v752_v0 = vadd.f32 %v720_v29, %v647_v7  ;;  %v917_v39 = vadd.f32 %v1399_v60, %v881_v47  ;;  %v583_v49 = vadd.f32 %v551_v31, %v518_v3  ;;  %v786_v57 = vmul.f32 %v1217_v20, %v683_v36  ;;  %v220_v3 = vld [vmem:[#allocation2 + $0x190] sm:$0xff] }
  0xae   :  { %v318_v55 = vmul.f32 %v1199_v11, %v217_v4  ;;  %v851_v52 = vmul.f32 %v1281_v46, %v684_v54  ;;  %v519_v15 = vadd.f32 %v487_v58, %v414_v38  ;;  %v617_v1 = vmul.f32 %v1205_v14, %v1784_v16  ;;  %v688_v54 = vld [vmem:[#allocation2 + $0x172] sm:$0xff] }
  0xaf   :  { %v817_v26 = vadd.f32 %v785_v41, %v752_v0  ;;  %949 = vst [vmem:[#allocation8 + $0x68] sm:$0xff] %v917_v39  ;;  %v648_v25 = vadd.f32 %v616_v32, %v583_v49  ;;  %v383_v40 = vmul.f32 %v1201_v12, %v218_v28  ;;  %v488_v56 = vmul.f32 %v1197_v10, %v1783_v34 }
  0xb0   :  { %v350_v2 = vadd.f32 %v318_v55, %v253_v17  ;;  %v584_v23 = vadd.f32 %v552_v59, %v519_v15  ;;  %v722_v63 = vmul.f32 %v1215_v19, %v685_v35  ;;  %v553_v21 = vmul.f32 %v1203_v13, %v1784_v16 }
  0xb1   :  { %v882_v36 = vadd.f32 %v850_v53, %v817_v26  ;;  %v753_v29 = vadd.f32 %v721_v45, %v648_v25  ;;  %v254_v51 = vmul.f32 %v1195_v6, %v217_v4  ;;  %v319_v42 = vmul.f32 %v1199_v11, %v218_v28 }
  0xb2   :  { %v415_v9 = vadd.f32 %v383_v40, %v350_v2  ;;  %v649_v41 = vadd.f32 %v617_v1, %v584_v23  ;;  %v618_v53 = vmul.f32 %v1205_v14, %v1348_v62  ;;  %v384_v33 = vmul.f32 %v1201_v12, %v219_v5  ;;  %v689_v23 = vld [vmem:[#allocation2 + $0x182] sm:$0xff] }
  0xb3   :  { %v918_v44 = vadd.f32 %v1399_v60, %v882_v36  ;;  %v818_v8 = vadd.f32 %v786_v57, %v753_v29  ;;  %v351_v22 = vadd.f32 %v319_v42, %v254_v51  ;;  %v489_v61 = vmul.f32 %v1197_v10, %v1784_v16  ;;  %v221_v16 = vld [vmem:[#allocation2 + $0x1a0] sm:$0xff] }
  0xb4   :  { %v520_v50 = vadd.f32 %v488_v56, %v415_v9  ;;  %v754_v31 = vadd.f32 %v722_v63, %v649_v41  ;;  %v787_v4 = vmul.f32 %v1217_v20, %v686_v30  ;;  %v852_v7 = vmul.f32 %v1281_v46, %v687_v43  ;;  %v222_v41 = vld [vmem:[#allocation2 + $0x1b0] sm:$0xff] }
  0xb5   :  { %950 = vst [vmem:[#allocation8 + $0x70] sm:$0xff] %v918_v44  ;;  %v883_v27 = vadd.f32 %v851_v52, %v818_v8  ;;  %v416_v58 = vadd.f32 %v384_v33, %v351_v22  ;;  %v554_v47 = vmul.f32 %v1203_v13, %v1348_v62  ;;  %v723_v45 = vmul.f32 %v1215_v19, %v686_v30 }
  0xb6   :  { %v585_v48 = vadd.f32 %v553_v21, %v520_v50  ;;  %v819_v32 = vadd.f32 %v787_v4, %v754_v31  ;;  %v255_v0 = vmul.f32 %v1195_v6, %v218_v28  ;;  %v320_v38 = vmul.f32 %v1199_v11, %v219_v5 }
  0xb7   :  { %v919_v34 = vadd.f32 %v1399_v60, %v883_v27  ;;  %v521_v17 = vadd.f32 %v489_v61, %v416_v58  ;;  %v619_v39 = vmul.f32 %v1205_v14, %v1353_v18  ;;  %v385_v35 = vmul.f32 %v1201_v12, %v220_v3  ;;  %v690_v61 = vld [vmem:[#allocation2 + $0x192] sm:$0xff] }
  0xb8   :  { %v650_v59 = vadd.f32 %v618_v53, %v585_v48  ;;  %v884_v49 = vadd.f32 %v852_v7, %v819_v32  ;;  %v352_v57 = vadd.f32 %v320_v38, %v255_v0  ;;  %v490_v55 = vmul.f32 %v1197_v10, %v1348_v62 }
  0xb9   :  { %951 = vst [vmem:[#allocation8 + $0x78] sm:$0xff] %v919_v34  ;;  %v788_v28 = vmul.f32 %v1217_v20, %v687_v43  ;;  %v853_v52 = vmul.f32 %v1281_v46, %v688_v54  ;;  %v586_v15 = vadd.f32 %v554_v47, %v521_v17  ;;  %v555_v2 = vmul.f32 %v1203_v13, %v1353_v18  ;;  %v457_v17 = vld [vmem:[#allocation2 + $0x1b1] sm:$0xff] }
  0xba   :  { %v755_v26 = vadd.f32 %v723_v45, %v650_v59  ;;  %v920_v1 = vadd.f32 %v1399_v60, %v884_v49  ;;  %v417_v25 = vadd.f32 %v385_v35, %v352_v57  ;;  %v256_v40 = vmul.f32 %v1195_v6, %v219_v5  ;;  %v691_v59 = vld [vmem:[#allocation2 + $0x1a2] sm:$0xff] }
  0xbb   :  { %v651_v36 = vadd.f32 %v619_v39, %v586_v15  ;;  %v724_v62 = vmul.f32 %v1215_v19, %v687_v43  ;;  %v321_v63 = vmul.f32 %v1199_v11, %v220_v3  ;;  %v789_v21 = vmul.f32 %v1217_v20, %v688_v54  ;;  %v223_v35 = vld [vmem:[#allocation2 + $0x1c0] sm:$0xff] }
  0xbc   :  { %v820_v56 = vadd.f32 %v788_v28, %v755_v26  ;;  %952 = vst [vmem:[#allocation8 + $0x80] sm:$0xff] %v920_v1  ;;  %v522_v29 = vadd.f32 %v490_v55, %v417_v25  ;;  %v620_v30 = vmul.f32 %v1205_v14, %v1362_v24  ;;  %v386_v9 = vmul.f32 %v1201_v12, %v221_v16 }
  0xbd   :  { %v756_v42 = vadd.f32 %v724_v62, %v651_v36  ;;  %v353_v44 = vadd.f32 %v321_v63, %v256_v40  ;;  %v491_v5 = vmul.f32 %v1197_v10, %v1353_v18  ;;  %v854_v43 = vmul.f32 %v1281_v46, %v689_v23  ;;  %v1785_v18 = vld [vmem:[#allocation21_spill] sm:$0xff] }
  0xbe   :  { %v885_v51 = vadd.f32 %v853_v52, %v820_v56  ;;  %v587_v53 = vadd.f32 %v555_v2, %v522_v29  ;;  %v556_v33 = vmul.f32 %v1203_v13, %v1362_v24  ;;  %v257_v8 = vmul.f32 %v1195_v6, %v220_v3  ;;  %v692_v56 = vld [vmem:[#allocation2 + $0x1b2] sm:$0xff]  ;;  %v458_v29 = vld [vmem:[#allocation2 + $0x1c1] sm:$0xff] }
  0xbf   :  { %v821_v22 = vadd.f32 %v789_v21, %v756_v42  ;;  %v418_v31 = vadd.f32 %v386_v9, %v353_v44  ;;  %v322_v4 = vmul.f32 %v1199_v11, %v221_v16  ;;  %v725_v27 = vmul.f32 %v1215_v19, %v688_v54 }
  0xc0   :  { %v921_v50 = vadd.f32 %v1399_v60, %v885_v51  ;;  %v652_v7 = vadd.f32 %v620_v30, %v587_v53  ;;  %v621_v48 = vmul.f32 %v1205_v14, %v1785_v18  ;;  %v387_v58 = vmul.f32 %v1201_v12, %v222_v41 }
  0xc1   :  { %v886_v47 = vadd.f32 %v854_v43, %v821_v22  ;;  %v523_v32 = vadd.f32 %v491_v5, %v418_v31  ;;  %v354_v45 = vadd.f32 %v322_v4, %v257_v8  ;;  %v492_v3 = vmul.f32 %v1197_v10, %v1362_v24  ;;  %v226_v8 = vld [vmem:[#allocation2 + $0x1f0] sm:$0xff]  ;;  %v227_v4 = vld [vmem:[#allocation2 + $0x200] sm:$0xff] }
  0xc2   :  { %953 = vst [vmem:[#allocation8 + $0x88] sm:$0xff] %v921_v50  ;;  %v757_v0 = vadd.f32 %v725_v27, %v652_v7  ;;  %v790_v38 = vmul.f32 %v1217_v20, %v689_v23  ;;  %v855_v34 = vmul.f32 %v1281_v46, %v690_v61  ;;  %v557_v54 = vmul.f32 %v1203_v13, %v1785_v18  ;;  %v459_v31 = vld [vmem:[#allocation2 + $0x1d1] sm:$0xff] }
  0xc3   :  { %v922_v39 = vadd.f32 %v1399_v60, %v886_v47  ;;  %v588_v49 = vadd.f32 %v556_v33, %v523_v32  ;;  %v419_v57 = vadd.f32 %v387_v58, %v354_v45  ;;  %v258_v55 = vmul.f32 %v1195_v6, %v221_v16  ;;  %v460_v58 = vld [vmem:[#allocation2 + $0x1e1] sm:$0xff] }
  0xc4   :  { %v822_v26 = vadd.f32 %v790_v38, %v757_v0  ;;  %v726_v24 = vmul.f32 %v1215_v19, %v689_v23  ;;  %v791_v28 = vmul.f32 %v1217_v20, %v690_v61  ;;  %v323_v52 = vmul.f32 %v1199_v11, %v222_v41  ;;  %v693_v32 = vld [vmem:[#allocation2 + $0x1c2] sm:$0xff] }
  0xc5   :  { %954 = vst [vmem:[#allocation8 + $0x90] sm:$0xff] %v922_v39  ;;  %v653_v15 = vadd.f32 %v621_v48, %v588_v49  ;;  %v856_v1 = vmul.f32 %v1281_v46, %v691_v59  ;;  %v524_v25 = vadd.f32 %v492_v3, %v419_v57  ;;  %v622_v2 = vmul.f32 %v1205_v14, %v457_v17  ;;  %v1633_v48 = vld [vmem:[#allocation2] sm:$0xff] }
  0xc6   :  { %v887_v40 = vadd.f32 %v855_v34, %v822_v26  ;;  %v355_v36 = vadd.f32 %v323_v52, %v258_v55  ;;  %v388_v62 = vmul.f32 %v1201_v12, %v223_v35  ;;  %v493_v16 = vmul.f32 %v1197_v10, %v1785_v18  ;;  %v1645_v55 = vld [vmem:[#allocation6 + $0x8] ss:$0 sm:$0xff] }
  0xc7   :  { %v758_v23 = vadd.f32 %v726_v24, %v653_v15  ;;  %v589_v63 = vadd.f32 %v557_v54, %v524_v25  ;;  %v727_v21 = vmul.f32 %v1215_v19, %v690_v61  ;;  %v259_v30 = vmul.f32 %v1195_v6, %v222_v41  ;;  %v461_v24 = vld [vmem:[#allocation2 + $0x1f1] sm:$0xff]  ;;  %v462_v25 = vld [vmem:[#allocation2 + $0x201] sm:$0xff] }
  0xc8   :  { %v923_v9 = vadd.f32 %v1399_v60, %v887_v40  ;;  %v792_v51 = vmul.f32 %v1217_v20, %v691_v59  ;;  %v420_v42 = vadd.f32 %v388_v62, %v355_v36  ;;  %v324_v44 = vmul.f32 %v1199_v11, %v223_v35  ;;  %v694_v15 = vld [vmem:[#allocation2 + $0x1d2] sm:$0xff] }
  0xc9   :  { %v823_v5 = vadd.f32 %v791_v28, %v758_v23  ;;  %v654_v43 = vadd.f32 %v622_v2, %v589_v63  ;;  %v857_v53 = vmul.f32 %v1281_v46, %v692_v56  ;;  %v558_v33 = vmul.f32 %v1203_v13, %v457_v17  ;;  %v228_v2 = vld [vmem:[#allocation2 + $0x210] sm:$0xff]  ;;  %v695_v23 = vld [vmem:[#allocation2 + $0x1e2] sm:$0xff] }
  0xca   :  { %955 = vst [vmem:[#allocation8 + $0x98] sm:$0xff] %v923_v9  ;;  %v525_v50 = vadd.f32 %v493_v16, %v420_v42  ;;  %v623_v22 = vmul.f32 %v1205_v14, %v458_v29  ;;  %v728_v41 = vmul.f32 %v1215_v19, %v691_v59  ;;  %v356_v61 = vadd.f32 %v324_v44, %v259_v30  ;;  %v696_v44 = vld [vmem:[#allocation2 + $0x1f2] sm:$0xff] }
  0xcb   :  { %v888_v7 = vadd.f32 %v856_v1, %v823_v5  ;;  %v759_v27 = vadd.f32 %v727_v21, %v654_v43  ;;  %v494_v18 = vmul.f32 %v1197_v10, %v457_v17  ;;  %v260_v46 = vmul.f32 %v1633_v48, %v1195_v6 }
  0xcc   :  { %v590_v47 = vadd.f32 %v558_v33, %v525_v50  ;;  %v421_v45 = vadd.f32 %v1425_v37, %v356_v61  ;;  %v559_v3 = vmul.f32 %v1203_v13, %v458_v29  ;;  %v325_v0 = vmul.f32 %v1199_v11, %v226_v8  ;;  %v229_v50 = vld [vmem:[#allocation2 + $0x220] sm:$0xff]  ;;  %v463_v61 = vld [vmem:[#allocation2 + $0x211] sm:$0xff] }
  0xcd   :  { %v924_v38 = vadd.f32 %v1399_v60, %v888_v7  ;;  %v824_v34 = vadd.f32 %v792_v51, %v759_v27  ;;  %v624_v59 = vmul.f32 %v1205_v14, %v459_v31  ;;  %v390_v17 = vmul.f32 %v1201_v12, %v227_v4 }
  0xce   :  { %v655_v54 = vadd.f32 %v623_v22, %v590_v47  ;;  %v526_v39 = vadd.f32 %v494_v18, %v421_v45  ;;  %v357_v49 = vadd.f32 %v325_v0, %v260_v46  ;;  %v495_v57 = vmul.f32 %v1197_v10, %v460_v58  ;;  %v697_v22 = vld [vmem:[#allocation2 + $0x202] sm:$0xff] }
  0xcf   :  { %956 = vst [vmem:[#allocation8 + $0xa0] sm:$0xff] %v924_v38  ;;  %v889_v35 = vadd.f32 %v857_v53, %v824_v34  ;;  %v793_v37 = vmul.f32 %v1217_v20, %v692_v56  ;;  %v858_v26 = vmul.f32 %v1645_v55, %v693_v32  ;;  %v261_v40 = vmul.f32 %v1195_v6, %v226_v8 }
  0xd0   :  { %v760_v28 = vadd.f32 %v728_v41, %v655_v54  ;;  %v591_v52 = vadd.f32 %v559_v3, %v526_v39  ;;  %v422_v1 = vadd.f32 %v390_v17, %v357_v49  ;;  %v729_v62 = vmul.f32 %v1215_v19, %v692_v56  ;;  %v698_v54 = vld [vmem:[#allocation2 + $0x212] sm:$0xff] }
  0xd1   :  { %v925_v36 = vadd.f32 %v1399_v60, %v889_v35  ;;  %v794_v16 = vmul.f32 %v1217_v20, %v693_v32  ;;  %v326_v63 = vmul.f32 %v1199_v11, %v227_v4  ;;  %v560_v9 = vmul.f32 %v1203_v13, %v461_v24 }
  0xd2   :  { %v825_v21 = vadd.f32 %v793_v37, %v760_v28  ;;  %v656_v29 = vadd.f32 %v624_v59, %v591_v52  ;;  %v527_v30 = vadd.f32 %v495_v57, %v422_v1  ;;  %v859_v51 = vmul.f32 %v1645_v55, %v694_v15  ;;  %v230_v57 = vld [vmem:[#allocation2 + $0x230] sm:$0xff]  ;;  %v464_v28 = vld [vmem:[#allocation2 + $0x221] sm:$0xff] }
  0xd3   :  { %957 = vst [vmem:[#allocation8 + $0xa8] sm:$0xff] %v925_v36  ;;  %v625_v42 = vmul.f32 %v1205_v14, %v462_v25  ;;  %v358_v5 = vadd.f32 %v326_v63, %v261_v40  ;;  %v391_v43 = vmul.f32 %v1201_v12, %v228_v2  ;;  %v730_v8 = vmul.f32 %v1215_v19, %v695_v23 }
  0xd4   :  { %v890_v56 = vadd.f32 %v858_v26, %v825_v21  ;;  %v761_v53 = vadd.f32 %v729_v62, %v656_v29  ;;  %v592_v33 = vadd.f32 %v560_v9, %v527_v30  ;;  %v496_v31 = vmul.f32 %v1197_v10, %v461_v24  ;;  %v231_v30 = vld [vmem:[#allocation2 + $0x240] sm:$0xff] }
  0xd5   :  { %v423_v41 = vadd.f32 %v391_v43, %v358_v5  ;;  %v262_v7 = vmul.f32 %v1195_v6, %v227_v4  ;;  %v327_v27 = vmul.f32 %v1199_v11, %v228_v2  ;;  %v795_v47 = vmul.f32 %v1217_v20, %v696_v44 }
  0xd6   :  { %v926_v18 = vadd.f32 %v1399_v60, %v890_v56  ;;  %v826_v46 = vadd.f32 %v794_v16, %v761_v53  ;;  %v657_v58 = vadd.f32 %v625_v42, %v592_v33  ;;  %v561_v45 = vmul.f32 %v1203_v13, %v462_v25 }
  0xd7   :  { %v528_v32 = vadd.f32 %v496_v31, %v423_v41  ;;  %v359_v3 = vadd.f32 %v327_v27, %v262_v7  ;;  %v392_v0 = vmul.f32 %v1201_v12, %v229_v50  ;;  %v860_v59 = vmul.f32 %v1645_v55, %v697_v22 }
  0xd8   :  { %958 = vst [vmem:[#allocation8 + $0xb0] sm:$0xff] %v926_v18  ;;  %v891_v38 = vadd.f32 %v859_v51, %v826_v46  ;;  %v762_v34 = vadd.f32 %v730_v8, %v657_v58  ;;  %v626_v4 = vmul.f32 %v1205_v14, %v463_v61  ;;  %v497_v49 = vmul.f32 %v1197_v10, %v462_v25  ;;  %v699_v51 = vld [vmem:[#allocation2 + $0x222] sm:$0xff]  ;;  %v700_v58 = vld [vmem:[#allocation2 + $0x232] sm:$0xff] }
  0xd9   :  { %v593_v17 = vadd.f32 %v561_v45, %v528_v32  ;;  %v424_v39 = vadd.f32 %v392_v0, %v359_v3  ;;  %v263_v35 = vmul.f32 %v1195_v6, %v228_v2  ;;  %v731_v24 = vmul.f32 %v1215_v19, %v696_v44  ;;  %v465_v44 = vld [vmem:[#allocation2 + $0x231] sm:$0xff]  ;;  %v1692_v3 = vld [vmem:[%s1744_s2] ss:$0 sm:$0xff]  ;;  %s1082_s2 = smov [#allocation8]  }
  0xda   :  { %v927_v37 = vadd.f32 %v1399_v60, %v891_v38  ;;  %v827_v26 = vadd.f32 %v795_v47, %v762_v34  ;;  %v328_v52 = vmul.f32 %v1199_v11, %v229_v50  ;;  %v796_v1 = vmul.f32 %v1217_v20, %v697_v22  ;;  %v232_v32 = vld [vmem:[#allocation2 + $0x250] sm:$0xff]  ;;  %s972_s26 = sshll.u32 %s1082_s2, 4  ;;  %s973_s26 = int_to_ptr.vmem [resolvable:$true] %s972_s26 }
  0xdb   :  { %v658_v15 = vadd.f32 %v626_v4, %v593_v17  ;;  %v529_v40 = vadd.f32 %v497_v49, %v424_v39  ;;  %v562_v36 = vmul.f32 %v1203_v13, %v463_v61  ;;  %v861_v25 = vmul.f32 %v1645_v55, %v698_v54 }
  0xdc   :  { %959 = vst [vmem:[#allocation8 + $0xb8] sm:$0xff] %v927_v37  ;;  %v892_v62 = vadd.f32 %v860_v59, %v827_v26  ;;  %v360_v16 = vadd.f32 %v328_v52, %v263_v35  ;;  %v393_v2 = vmul.f32 %v1201_v12, %v230_v57  ;;  %v627_v21 = vmul.f32 %v1205_v14, %v464_v28  ;;  %v466_v59 = vld [vmem:[#allocation2 + $0x241] sm:$0xff] }
  0xdd   :  { %v763_v23 = vadd.f32 %v731_v24, %v658_v15  ;;  %v594_v63 = vadd.f32 %v562_v36, %v529_v40  ;;  %v498_v29 = vmul.f32 %v1197_v10, %v463_v61  ;;  %v264_v5 = vmul.f32 %v1195_v6, %v229_v50  ;;  %v701_v36 = vld [vmem:[#allocation2 + $0x242] sm:$0xff] }
  0xde   :  { %v928_v9 = vadd.f32 %v1399_v60, %v892_v62  ;;  %v425_v42 = vadd.f32 %v393_v2, %v360_v16  ;;  %v329_v43 = vmul.f32 %v1199_v11, %v230_v57  ;;  %v732_v33 = vmul.f32 %v1215_v19, %v697_v22 }
  0xdf   :  { %v828_v56 = vadd.f32 %v796_v1, %v763_v23  ;;  %v659_v53 = vadd.f32 %v627_v21, %v594_v63  ;;  %v797_v8 = vmul.f32 %v1217_v20, %v698_v54  ;;  %v563_v61 = vmul.f32 %v1203_v13, %v464_v28  ;;  %v233_v1 = vld [vmem:[#allocation2 + $0x260] sm:$0xff] }
  0xe0   :  { %960 = vst [vmem:[#allocation8 + $0xc0] sm:$0xff] %v928_v9  ;;  %v530_v41 = vadd.f32 %v498_v29, %v425_v42  ;;  %v361_v31 = vadd.f32 %v329_v43, %v264_v5  ;;  %v394_v60 = vmul.f32 %v1201_v12, %v231_v30  ;;  %v862_v18 = vmul.f32 %v1645_v55, %v699_v51 }
  0xe1   :  { %v893_v7 = vadd.f32 %v861_v25, %v828_v56  ;;  %v764_v27 = vadd.f32 %v732_v33, %v659_v53  ;;  %v628_v50 = vmul.f32 %v1205_v14, %v465_v44  ;;  %v499_v22 = vmul.f32 %v1197_v10, %v464_v28  ;;  %v467_v25 = vld [vmem:[#allocation2 + $0x251] sm:$0xff] }
  0xe2   :  { %v595_v46 = vadd.f32 %v563_v61, %v530_v41  ;;  %v426_v47 = vadd.f32 %v394_v60, %v361_v31  ;;  %v265_v45 = vmul.f32 %v1195_v6, %v230_v57  ;;  %v733_v34 = vmul.f32 %v1215_v19, %v698_v54  ;;  %v468_v60 = vld [vmem:[#allocation2 + $0x261] sm:$0xff] }
  0xe3   :  { %v929_v0 = vadd.f32 %v1692_v3, %v893_v7  ;;  %v829_v38 = vadd.f32 %v797_v8, %v764_v27  ;;  %v330_v4 = vmul.f32 %v1199_v11, %v231_v30  ;;  %v798_v39 = vmul.f32 %v1217_v20, %v699_v51 }
  0xe4   :  { %v660_v17 = vadd.f32 %v628_v50, %v595_v46  ;;  %v531_v49 = vadd.f32 %v499_v22, %v426_v47  ;;  %v564_v35 = vmul.f32 %v1203_v13, %v465_v44  ;;  %v863_v37 = vmul.f32 %v1645_v55, %v700_v58 }
  0xe5   :  { %961 = vst [vmem:[#allocation8 + $0xc8] sm:$0xff] %v929_v0  ;;  %v894_v57 = vadd.f32 %v862_v18, %v829_v38  ;;  %v362_v26 = vadd.f32 %v330_v4, %v265_v45  ;;  %v395_v24 = vmul.f32 %v1201_v12, %v232_v32  ;;  %v629_v54 = vmul.f32 %v1205_v14, %v466_v59  ;;  %v702_v45 = vld [vmem:[#allocation2 + $0x252] sm:$0xff] }
  0xe6   :  { %v765_v28 = vadd.f32 %v733_v34, %v660_v17  ;;  %v596_v52 = vadd.f32 %v564_v35, %v531_v49  ;;  %v500_v15 = vmul.f32 %v1197_v10, %v465_v44  ;;  %v266_v16 = vmul.f32 %v1195_v6, %v231_v30  ;;  %v703_v49 = vld [vmem:[#allocation2 + $0x262] sm:$0xff] }
  0xe7   :  { %v930_v40 = vadd.f32 %v1692_v3, %v894_v57  ;;  %v427_v62 = vadd.f32 %v395_v24, %v362_v26  ;;  %v331_v2 = vmul.f32 %v1199_v11, %v232_v32  ;;  %v734_v21 = vmul.f32 %v1215_v19, %v699_v51 }
  0xe8   :  { %v830_v23 = vadd.f32 %v798_v39, %v765_v28  ;;  %v661_v63 = vadd.f32 %v629_v54, %v596_v52  ;;  %v799_v29 = vmul.f32 %v1217_v20, %v700_v58  ;;  %v565_v42 = vmul.f32 %v1203_v13, %v466_v59 }
  0xe9   :  { %962 = vst [vmem:[#allocation8 + $0xd0] sm:$0xff] %v930_v40  ;;  %v532_v9 = vadd.f32 %v500_v15, %v427_v62  ;;  %v363_v44 = vadd.f32 %v331_v2, %v266_v16  ;;  %v396_v5 = vmul.f32 %v1201_v12, %v233_v1  ;;  %v864_v53 = vmul.f32 %v1645_v55, %v701_v36  ;;  %v704_v62 = vld [vmem:[#allocation2 + $0x272] sm:$0xff] }
  0xea   :  { %v895_v43 = vadd.f32 %v863_v37, %v830_v23  ;;  %v766_v56 = vadd.f32 %v734_v21, %v661_v63  ;;  %v630_v30 = vmul.f32 %v1205_v14, %v467_v25  ;;  %v501_v41 = vmul.f32 %v1197_v10, %v466_v59 }
  0xeb   :  { %v597_v33 = vadd.f32 %v565_v42, %v532_v9  ;;  %v428_v8 = vadd.f32 %v396_v5, %v363_v44  ;;  %v267_v51 = vmul.f32 %v1195_v6, %v232_v32  ;;  %v332_v7 = vmul.f32 %v1199_v11, %v233_v1  ;;  %v469_v11 = vld [vmem:[#allocation2 + $0x271] sm:$0xff] }
  0xec   :  { %v931_v61 = vadd.f32 %v1692_v3, %v895_v43  ;;  %v831_v31 = vadd.f32 %v799_v29, %v766_v56  ;;  %v397_v27 = vmul.f32 %v1633_v48, %v1201_v12  ;;  %v735_v50 = vmul.f32 %v1215_v19, %v700_v58 }
  0xed   :  { %v662_v18 = vadd.f32 %v630_v30, %v597_v33  ;;  %v533_v46 = vadd.f32 %v501_v41, %v428_v8  ;;  %v566_v47 = vmul.f32 %v1203_v13, %v467_v25  ;;  %v364_v0 = vadd.f32 %v332_v7, %v267_v51 }
  0xee   :  { %963 = vst [vmem:[#allocation8 + $0xd8] sm:$0xff] %v931_v61  ;;  %v896_v22 = vadd.f32 %v864_v53, %v831_v31  ;;  %v800_v32 = vmul.f32 %v1217_v20, %v701_v36  ;;  %v631_v34 = vmul.f32 %v1205_v14, %v468_v60  ;;  %v502_v48 = vmul.f32 %v1197_v10, %v467_v25 }
  0xef   :  { %v767_v6 = vadd.f32 %v735_v50, %v662_v18  ;;  %v598_v38 = vadd.f32 %v566_v47, %v533_v46  ;;  %v429_v12 = vadd.f32 %v397_v27, %v364_v0  ;;  %v865_v4 = vmul.f32 %v1645_v55, %v702_v45 }
  0xf0   :  { %v932_v59 = vadd.f32 %v1692_v3, %v896_v22  ;;  %v736_v39 = vmul.f32 %v1215_v19, %v701_v36  ;;  %v567_v57 = vmul.f32 %v1203_v13, %v468_v60  ;;  %v632_v37 = vmul.f32 %v1205_v14, %v469_v11 }
  0xf1   :  { %v832_v58 = vadd.f32 %v800_v32, %v767_v6  ;;  %v663_v17 = vadd.f32 %v631_v34, %v598_v38  ;;  %v534_v35 = vadd.f32 %v502_v48, %v429_v12  ;;  %v801_v28 = vmul.f32 %v1217_v20, %v702_v45 }
  0xf2   :  { %964 = vst [vmem:[#allocation8 + $0xe0] sm:$0xff] %v932_v59  ;;  %v866_v15 = vmul.f32 %v1645_v55, %v703_v49  ;;  %v737_v40 = vmul.f32 %v1215_v19, %v702_v45  ;;  %v802_v13 = vmul.f32 %v1217_v20, %v703_v49  ;;  %v867_v2 = vmul.f32 %v1645_v55, %v704_v62 }
  0xf3   :  { %v897_v26 = vadd.f32 %v865_v4, %v832_v58  ;;  %v768_v24 = vadd.f32 %v736_v39, %v663_v17  ;;  %v599_v52 = vadd.f32 %v567_v57, %v534_v35 }
  0xf5   :  { %v933_v10 = vadd.f32 %v1692_v3, %v897_v26  ;;  %v833_v54 = vadd.f32 %v801_v28, %v768_v24  ;;  %v664_v1 = vadd.f32 %v632_v37, %v599_v52 }
  0xf7   :  { %965 = vst [vmem:[#allocation8 + $0xe8] sm:$0xff] %v933_v10  ;;  %v898_v36 = vadd.f32 %v866_v15, %v833_v54  ;;  %v769_v25 = vadd.f32 %v737_v40, %v664_v1 }
  0xf9   :  { %v934_v14 = vadd.f32 %v1692_v3, %v898_v36  ;;  %v834_v16 = vadd.f32 %v802_v13, %v769_v25 }
  0xfb   :  { %966 = vst [vmem:[#allocation8 + $0xf0] sm:$0xff] %v934_v14  ;;  %v899_v23 = vadd.f32 %v867_v2, %v834_v16 }
  0xfd   :  { %v935_v19 = vadd.f32 %v1692_v3, %v899_v23 }
  0xff   :  { %967 = vst [vmem:[#allocation8 + $0xf8] sm:$0xff] %v935_v19 }
 0x100   :  { %980 = dma.vmem_to_hbm [thread:$0]  %s973_s26, 4096, %s975_s29, [#allocation5], %s1078_s20, %s1078_s20, %s1079_s21  }
 0x101   :  { %1075 = dma.done.wait [#allocation5], 4096  }
 0x102   :  { %1076 = vsyncadd [#allocation5], 4294963200 }
 0x103   :  { %985 = vsyncpa [#allocation4], 1 }
 0x104   :  { %986 = vsyncpa [#allocation7], 1 }
 0x105   :  { %987 = vsyncpa [#allocation5], 1 }

</bundles_post_ra>
